<compile_context>
chip_gen: v7x
topology: tpu7x:2x2x1
jax: 0.10.0
libtpu: 0.0.40
codegen_flags: <defaults>
</compile_context>

<pallas_src>
import functools
import numpy as np
import jax
import jax.numpy as jnp
from jax import lax
from jax.experimental import pallas as pl
from jax.experimental.pallas import tpu as pltpu

BN_EPS = 1e-5       # torch.nn.BatchNorm1d default
NORM_EPS = 1e-12    # F.normalize default
LANE = 128          # pad all feature/hidden dims to the 128-lane vreg width
ROW_PAD = 16        # pad node counts to a multiple of 16 sublanes (bf16 packs 2 rows)


def _round_up(x, m):
    return ((x + m - 1) // m) * m


def _vmem():
    return pl.BlockSpec(memory_space=pltpu.MemorySpace.VMEM)


# ----------------------------------------------------------------------------
# In-kernel building blocks (traced inside the single fused pallas_call)
# ----------------------------------------------------------------------------
def _bn_relu(z, gamma, beta, row_mask, inv_n):
    """BatchNorm1d with batch statistics (biased var) + ReLU.

    Padded rows are excluded from the statistics via row_mask and zeroed in the
    output; padded feature columns have gamma = beta = 0 so they stay exactly 0.
    BN is applied as a precomputed per-column scale/shift (one mul + add per elem).
    """
    zm = z * row_mask
    mu = jnp.sum(zm, axis=0, keepdims=True) * inv_n
    d = (z - mu) * row_mask
    var = jnp.sum(d * d, axis=0, keepdims=True) * inv_n
    scale = gamma * lax.rsqrt(var + BN_EPS)
    shift = beta - mu * scale
    return jnp.maximum(z * scale + shift, 0.0) * row_mask


def _gin_layer(a, h, w1, w2, g1, b1, g2, b2, row_mask, inv_n):
    """GINConv(eps=0, sum) + 2-layer MLP(BN+ReLU) + encoder BN + ReLU.

    a already contains the added self loops (A + I), bf16. h is bf16;
    matmuls accumulate in f32 on the MXU.
    """
    agg = jnp.dot(a, h, preferred_element_type=jnp.float32)           # (A+I) @ H
    z1 = jnp.dot(agg.astype(jnp.bfloat16), w1, preferred_element_type=jnp.float32)
    h1 = _bn_relu(z1, g1, b1, row_mask, inv_n)                        # MLP BN + ReLU
    z2 = jnp.dot(h1.astype(jnp.bfloat16), w2, preferred_element_type=jnp.float32)
    h2 = _bn_relu(z2, g2, b2, row_mask, inv_n)                        # encoder BN + ReLU
    return h2.astype(jnp.bfloat16)


def cg_fused_kernel(a1_ref, x1_ref, rm1_ref, a2_ref, x2_ref, rm2_ref, sel_ref,
                    ow1_ref, ow2_ref, og1_ref, ob1_ref, og2_ref, ob2_ref,
                    tw1_ref, tw2_ref, tg1_ref, tb1_ref, tg2_ref, tb2_ref,
                    loss_ref, *, n1, n2, layers, alpha):
    rm1 = rm1_ref[...]            # [N1p, 1] f32 valid-row mask (full graph)
    rm2 = rm2_ref[...]            # [N2p, 1] f32 valid-row mask (ring subgraph)
    inv_n1 = 1.0 / n1
    inv_n2 = 1.0 / n2

    # ---- online encoder on the full (masked-feature) graph; H stays resident ----
    h1 = x1_ref[...]
    for l in range(layers):       # static unroll over layers
        h1 = _gin_layer(a1_ref[...], h1, ow1_ref[l], ow2_ref[l],
                        og1_ref[l], ob1_ref[l], og2_ref[l], ob2_ref[l],
                        rm1, inv_n1)

    # ---- target encoder on the ring subgraph (no-grad in the reference) ----
    h2 = x2_ref[...]
    for l in range(layers):
        h2 = _gin_layer(a2_ref[...], h2, tw1_ref[l], tw2_ref[l],
                        tg1_ref[l], tb1_ref[l], tg2_ref[l], tb2_ref[l],
                        rm2, inv_n2)

    # ---- gather h1[ring_nodes] as a one-hot selection matmul (MXU-friendly) ----
    h1s = jnp.dot(sel_ref[...], h1, preferred_element_type=jnp.float32)   # [N2p, Hp]
    h2f = h2.astype(jnp.float32)

    # ---- SCE loss (alpha = 1 per CG.setup_loss_fn('sce')); padding masked ----
    xn = h1s / jnp.maximum(jnp.sqrt(jnp.sum(h1s * h1s, axis=-1, keepdims=True)), NORM_EPS)
    yn = h2f / jnp.maximum(jnp.sqrt(jnp.sum(h2f * h2f, axis=-1, keepdims=True)), NORM_EPS)
    cos = jnp.sum(xn * yn, axis=-1, keepdims=True)                        # [N2p, 1]
    per_row = (1.0 - cos) if alpha == 1 else (1.0 - cos) ** alpha
    loss_ref[...] = jnp.sum(per_row * rm2, axis=0, keepdims=True) * (1.0 / n2)


def cg_fused_forward(a1, x1, a2, x2, sel, rm1, rm2,
                     online_params, target_params, n1, n2, alpha=1):
    layers = online_params["w1"].shape[0]
    kernel = functools.partial(cg_fused_kernel, n1=float(n1), n2=float(n2),
                               layers=layers, alpha=alpha)
    loss = pl.pallas_call(
        kernel,
        out_shape=jax.ShapeDtypeStruct((1, 1), jnp.float32),
        in_specs=[_vmem()] * 19,
        out_specs=_vmem(),
    )(a1, x1, rm1, a2, x2, rm2, sel,
      online_params["w1"], online_params["w2"],
      online_params["g1"], online_params["b1"],
      online_params["g2"], online_params["b2"],
      target_params["w1"], target_params["w2"],
      target_params["g1"], target_params["b1"],
      target_params["g2"], target_params["b2"])
    return loss[0, 0]


# ----------------------------------------------------------------------------
# Parameter init (deterministic synthetic): Linear ~ N(0, 1/fan_in), BN gamma=1 beta=0,
# zero-padded to LANE lanes so every layer has uniform [L, 128, 128] stacked shapes.
# ----------------------------------------------------------------------------
def init_encoder_params(key, in_hidden, out_hidden, hidden, layers, pad=LANE):
    w1s, w2s, g1s, b1s, g2s, b2s = [], [], [], [], [], []
    for layer in range(layers):
        din = in_hidden if layer == 0 else hidden
        key, k1, k2 = jax.random.split(key, 3)
        w1 = jax.random.normal(k1, (din, out_hidden), jnp.float32) / np.sqrt(din)
        w2 = jax.random.normal(k2, (out_hidden, hidden), jnp.float32) / np.sqrt(out_hidden)
        w1s.append(jnp.zeros((pad, pad), jnp.float32).at[:din, :out_hidden].set(w1))
        w2s.append(jnp.zeros((pad, pad), jnp.float32).at[:out_hidden, :hidden].set(w2))
        g1s.append(jnp.zeros((1, pad), jnp.float32).at[:, :out_hidden].set(1.0))
        b1s.append(jnp.zeros((1, pad), jnp.float32))
        g2s.append(jnp.zeros((1, pad), jnp.float32).at[:, :hidden].set(1.0))
        b2s.append(jnp.zeros((1, pad), jnp.float32))
    return {
        "w1": jnp.stack(w1s).astype(jnp.bfloat16),
        "w2": jnp.stack(w2s).astype(jnp.bfloat16),
        "g1": jnp.stack(g1s), "b1": jnp.stack(b1s),
        "g2": jnp.stack(g2s), "b2": jnp.stack(b2s),
    }


# ----------------------------------------------------------------------------
# Host-side (numpy) graph masking helpers — mirrors get_all_neighbors / mask.
# Dynamic-size set ops (unique, masked_select, subgraph) have no static-shape
# Pallas equivalent, so they run on the host as setup/glue.
# ----------------------------------------------------------------------------
def get_all_neighbors_np(adj, nodes, depth):
    level = [np.asarray(nodes, dtype=np.int64)]
    if depth == 0:
        return level[0], level
    one_hot = np.eye(adj.shape[0], dtype=adj.dtype)[nodes]
    cur = one_hot @ adj
    nbr = np.union1d(np.nonzero(cur)[1], level[0])
    level.append(nbr)
    for i in range(2, depth + 1):
        cur = cur @ adj
        nbr = np.union1d(np.nonzero(cur)[1], level[i - 1])
        level.append(nbr)
    return nbr, level


def mask_np(adj, num, depth, ring_width, rng):
    assert 1 <= ring_width <= depth + 1
    n = adj.shape[0]
    central = rng.permutation(n)[:num]
    connected, level = get_all_neighbors_np(adj, central, depth)
    mask_out = np.union1d(central, connected)
    if depth - ring_width >= 0:
        not_mask = level[depth - ring_width]
    else:
        not_mask = np.array([], dtype=np.int64)
    ring = mask_out[~np.isin(mask_out, not_mask)]
    return ring, central


# ----------------------------------------------------------------------------
# CG.forward
# ----------------------------------------------------------------------------
def cg_forward(A, feat, online_params, target_params, enc_mask_token,
               depth, ring_width, rng):
    N, D = feat.shape
    nodes_num = 1
    ring_nodes, central_nodes = mask_np(A, nodes_num, depth, ring_width, rng)
    mask_nodes = np.concatenate([ring_nodes, central_nodes]).astype(np.int32)
    assert ring_nodes.shape[0] > 1, "ring too small for BatchNorm on target encoder"

    # remainder_graph_feat[mask_nodes] = 0 ; += enc_mask_token  -> one scatter
    remainder_feat = feat.at[jnp.asarray(mask_nodes)].set(enc_mask_token[0])

    n1 = N
    n2 = int(ring_nodes.shape[0])
    n1p = _round_up(n1, ROW_PAD)
    n2p = _round_up(max(n2, ROW_PAD), ROW_PAD)
    dp = LANE

    # padded A + I (online, full graph) and sub-adjacency + I (target, ring subgraph)
    a1 = np.zeros((n1p, n1p), np.float32)
    a1[:n1, :n1] = A + np.eye(n1, dtype=np.float32)
    a_sub = A[np.ix_(ring_nodes, ring_nodes)]
    a2 = np.zeros((n2p, n2p), np.float32)
    a2[:n2, :n2] = a_sub + np.eye(n2, dtype=np.float32)

    # padded node features (lane-dense, 128 wide)
    x1 = jnp.zeros((n1p, dp), jnp.float32).at[:n1, :D].set(remainder_feat)
    x2 = jnp.zeros((n2p, dp), jnp.float32).at[:n2, :D].set(feat[jnp.asarray(ring_nodes.astype(np.int32))])

    # one-hot row-selection matrix: (S @ h1)[i] = h1[ring_nodes[i]]
    sel = np.zeros((n2p, n1p), np.float32)
    sel[np.arange(n2), ring_nodes] = 1.0

    # valid-row masks
    rm1 = np.zeros((n1p, 1), np.float32); rm1[:n1] = 1.0
    rm2 = np.zeros((n2p, 1), np.float32); rm2[:n2] = 1.0

    # TODO(synk): the reference computes criterion(h1[mask_nodes], h2) where
    # len(mask_nodes) = len(ring_nodes)+1 != len(ring_nodes) = h2.shape[0]
    # (a shape mismatch in the original code); we align the rows on ring_nodes.
    # SumPooling outputs of Encoder1 are dead in CG.forward and therefore omitted.
    loss = cg_fused_forward(
        jnp.asarray(a1, jnp.bfloat16), x1.astype(jnp.bfloat16),
        jnp.asarray(a2, jnp.bfloat16), x2.astype(jnp.bfloat16),
        jnp.asarray(sel, jnp.bfloat16),
        jnp.asarray(rm1), jnp.asarray(rm2),
        online_params, target_params, n1, n2, alpha=1)
    return loss


if __name__ == "__main__":
    # small, deterministic configuration
    in_hidden, out_hidden, hidden = 16, 32, 32
    layers, depth, ring_width = 2, 2, 1
    N = 24

    # deterministic graph: a cycle plus a few random chords (symmetric, no self-loops)
    rng = np.random.default_rng(0)
    A = np.zeros((N, N), dtype=np.float32)
    for i in range(N):
        A[i, (i + 1) % N] = 1.0
        A[(i + 1) % N, i] = 1.0
    for u, v in rng.integers(0, N, size=(6, 2)):
        if u != v:
            A[u, v] = 1.0
            A[v, u] = 1.0

    key = jax.random.PRNGKey(0)
    key, kf, ko, kt = jax.random.split(key, 4)
    feat = jax.random.normal(kf, (N, in_hidden), jnp.float32)

    online_params = init_encoder_params(ko, in_hidden, out_hidden, hidden, layers)
    target_params = init_encoder_params(kt, in_hidden, out_hidden, hidden, layers)
    enc_mask_token = jnp.zeros((1, in_hidden), jnp.float32)  # nn.Parameter(torch.zeros(1, in_hidden))

    loss = cg_forward(A, feat, online_params, target_params, enc_mask_token,
                      depth, ring_width, rng)
    jax.block_until_ready(loss)
    assert np.isfinite(float(loss))
    print("KERNEL_OK")
</pallas_src>

<mosaic_0001>
module attributes {stable_mosaic.version = 11 : i64} {
  func.func @cg_fused_kernel(%arg0: memref<32x32xbf16, #tpu.memory_space<vmem>>, %arg1: memref<32x128xbf16, #tpu.memory_space<vmem>>, %arg2: memref<32x1xf32, #tpu.memory_space<vmem>>, %arg3: memref<16x16xbf16, #tpu.memory_space<vmem>>, %arg4: memref<16x128xbf16, #tpu.memory_space<vmem>>, %arg5: memref<16x1xf32, #tpu.memory_space<vmem>>, %arg6: memref<16x32xbf16, #tpu.memory_space<vmem>>, %arg7: memref<2x128x128xbf16, #tpu.memory_space<vmem>>, %arg8: memref<2x128x128xbf16, #tpu.memory_space<vmem>>, %arg9: memref<2x1x128xf32, #tpu.memory_space<vmem>>, %arg10: memref<2x1x128xf32, #tpu.memory_space<vmem>>, %arg11: memref<2x1x128xf32, #tpu.memory_space<vmem>>, %arg12: memref<2x1x128xf32, #tpu.memory_space<vmem>>, %arg13: memref<2x128x128xbf16, #tpu.memory_space<vmem>>, %arg14: memref<2x128x128xbf16, #tpu.memory_space<vmem>>, %arg15: memref<2x1x128xf32, #tpu.memory_space<vmem>>, %arg16: memref<2x1x128xf32, #tpu.memory_space<vmem>>, %arg17: memref<2x1x128xf32, #tpu.memory_space<vmem>>, %arg18: memref<2x1x128xf32, #tpu.memory_space<vmem>>, %arg19: memref<1x1xf32, #tpu.memory_space<vmem>>) attributes {dimension_semantics = [], scalar_prefetch = 0 : i64, scratch_operands = 0 : i64, tpu.core_type = #tpu.core_type<tc>} {
    %c0 = arith.constant 0 : index
    %c0_0 = arith.constant 0 : index
    %0 = vector.load %arg2[%c0, %c0_0] : memref<32x1xf32, #tpu.memory_space<vmem>>, vector<32x1xf32>
    %c0_1 = arith.constant 0 : index
    %c0_2 = arith.constant 0 : index
    %1 = vector.load %arg5[%c0_1, %c0_2] : memref<16x1xf32, #tpu.memory_space<vmem>>, vector<16x1xf32>
    %c0_3 = arith.constant 0 : index
    %c0_4 = arith.constant 0 : index
    %2 = vector.load %arg1[%c0_3, %c0_4] : memref<32x128xbf16, #tpu.memory_space<vmem>>, vector<32x128xbf16>
    %c0_5 = arith.constant 0 : index
    %c0_6 = arith.constant 0 : index
    %3 = vector.load %arg0[%c0_5, %c0_6] : memref<32x32xbf16, #tpu.memory_space<vmem>>, vector<32x32xbf16>
    %c0_7 = arith.constant 0 : index
    %c0_8 = arith.constant 0 : index
    %c0_9 = arith.constant 0 : index
    %4 = vector.load %arg7[%c0_7, %c0_8, %c0_9] : memref<2x128x128xbf16, #tpu.memory_space<vmem>>, vector<1x128x128xbf16>
    %5 = vector.shape_cast %4 : vector<1x128x128xbf16> to vector<128x128xbf16>
    %c0_10 = arith.constant 0 : index
    %c0_11 = arith.constant 0 : index
    %c0_12 = arith.constant 0 : index
    %6 = vector.load %arg8[%c0_10, %c0_11, %c0_12] : memref<2x128x128xbf16, #tpu.memory_space<vmem>>, vector<1x128x128xbf16>
    %7 = vector.shape_cast %6 : vector<1x128x128xbf16> to vector<128x128xbf16>
    %c0_13 = arith.constant 0 : index
    %c0_14 = arith.constant 0 : index
    %c0_15 = arith.constant 0 : index
    %8 = vector.load %arg9[%c0_13, %c0_14, %c0_15] : memref<2x1x128xf32, #tpu.memory_space<vmem>>, vector<1x1x128xf32>
    %9 = vector.shape_cast %8 : vector<1x1x128xf32> to vector<1x128xf32>
    %c0_16 = arith.constant 0 : index
    %c0_17 = arith.constant 0 : index
    %c0_18 = arith.constant 0 : index
    %10 = vector.load %arg10[%c0_16, %c0_17, %c0_18] : memref<2x1x128xf32, #tpu.memory_space<vmem>>, vector<1x1x128xf32>
    %11 = vector.shape_cast %10 : vector<1x1x128xf32> to vector<1x128xf32>
    %c0_19 = arith.constant 0 : index
    %c0_20 = arith.constant 0 : index
    %c0_21 = arith.constant 0 : index
    %12 = vector.load %arg11[%c0_19, %c0_20, %c0_21] : memref<2x1x128xf32, #tpu.memory_space<vmem>>, vector<1x1x128xf32>
    %13 = vector.shape_cast %12 : vector<1x1x128xf32> to vector<1x128xf32>
    %c0_22 = arith.constant 0 : index
    %c0_23 = arith.constant 0 : index
    %c0_24 = arith.constant 0 : index
    %14 = vector.load %arg12[%c0_22, %c0_23, %c0_24] : memref<2x1x128xf32, #tpu.memory_space<vmem>>, vector<1x1x128xf32>
    %15 = vector.shape_cast %14 : vector<1x1x128xf32> to vector<1x128xf32>
    %cst = arith.constant dense<0.000000e+00> : vector<32x128xf32>
    %16 = tpu.matmul %3, %2, %cst {dimension_numbers = #tpu.dot_dimension_numbers<[1], [0], [0], [1], [0, 0, 1, 1], [], []>} : vector<32x32xbf16>, vector<32x128xbf16>, vector<32x128xf32> -> vector<32x128xf32>
    %17 = arith.truncf %16 : vector<32x128xf32> to vector<32x128xbf16>
    %cst_25 = arith.constant dense<0.000000e+00> : vector<32x128xf32>
    %18 = tpu.matmul %17, %5, %cst_25 {dimension_numbers = #tpu.dot_dimension_numbers<[1], [0], [0], [1], [0, 0, 1, 1], [], []>} : vector<32x128xbf16>, vector<128x128xbf16>, vector<32x128xf32> -> vector<32x128xf32>
    %19 = vector.broadcast %0 : vector<32x1xf32> to vector<32x128xf32>
    %20 = arith.mulf %18, %19 : vector<32x128xf32>
    %cst_26 = arith.constant dense<0.000000e+00> : vector<128xf32>
    %21 = vector.multi_reduction <add>, %20, %cst_26 [0] : vector<32x128xf32> to vector<128xf32>
    %22 = vector.shape_cast %21 : vector<128xf32> to vector<1x128xf32>
    %cst_27 = arith.constant 0.0416666679 : f32
    %23 = vector.broadcast %cst_27 : f32 to vector<1x128xf32>
    %24 = arith.mulf %22, %23 : vector<1x128xf32>
    %25 = vector.broadcast %24 : vector<1x128xf32> to vector<32x128xf32>
    %26 = arith.subf %18, %25 : vector<32x128xf32>
    %27 = vector.broadcast %0 : vector<32x1xf32> to vector<32x128xf32>
    %28 = arith.mulf %26, %27 : vector<32x128xf32>
    %29 = arith.mulf %28, %28 : vector<32x128xf32>
    %cst_28 = arith.constant dense<0.000000e+00> : vector<128xf32>
    %30 = vector.multi_reduction <add>, %29, %cst_28 [0] : vector<32x128xf32> to vector<128xf32>
    %31 = vector.shape_cast %30 : vector<128xf32> to vector<1x128xf32>
    %cst_29 = arith.constant 0.0416666679 : f32
    %32 = vector.broadcast %cst_29 : f32 to vector<1x128xf32>
    %33 = arith.mulf %31, %32 : vector<1x128xf32>
    %cst_30 = arith.constant 9.99999974E-6 : f32
    %34 = vector.broadcast %cst_30 : f32 to vector<1x128xf32>
    %35 = arith.addf %33, %34 : vector<1x128xf32>
    %36 = math.rsqrt %35 : vector<1x128xf32>
    %37 = arith.mulf %9, %36 : vector<1x128xf32>
    %38 = arith.mulf %24, %37 : vector<1x128xf32>
    %39 = arith.subf %11, %38 : vector<1x128xf32>
    %40 = vector.broadcast %37 : vector<1x128xf32> to vector<32x128xf32>
    %41 = arith.mulf %18, %40 : vector<32x128xf32>
    %42 = vector.broadcast %39 : vector<1x128xf32> to vector<32x128xf32>
    %43 = arith.addf %41, %42 : vector<32x128xf32>
    %cst_31 = arith.constant 0.000000e+00 : f32
    %44 = vector.broadcast %cst_31 : f32 to vector<32x128xf32>
    %45 = arith.maximumf %43, %44 : vector<32x128xf32>
    %46 = vector.broadcast %0 : vector<32x1xf32> to vector<32x128xf32>
    %47 = arith.mulf %45, %46 : vector<32x128xf32>
    %48 = arith.truncf %47 : vector<32x128xf32> to vector<32x128xbf16>
    %cst_32 = arith.constant dense<0.000000e+00> : vector<32x128xf32>
    %49 = tpu.matmul %48, %7, %cst_32 {dimension_numbers = #tpu.dot_dimension_numbers<[1], [0], [0], [1], [0, 0, 1, 1], [], []>} : vector<32x128xbf16>, vector<128x128xbf16>, vector<32x128xf32> -> vector<32x128xf32>
    %50 = vector.broadcast %0 : vector<32x1xf32> to vector<32x128xf32>
    %51 = arith.mulf %49, %50 : vector<32x128xf32>
    %cst_33 = arith.constant dense<0.000000e+00> : vector<128xf32>
    %52 = vector.multi_reduction <add>, %51, %cst_33 [0] : vector<32x128xf32> to vector<128xf32>
    %53 = vector.shape_cast %52 : vector<128xf32> to vector<1x128xf32>
    %cst_34 = arith.constant 0.0416666679 : f32
    %54 = vector.broadcast %cst_34 : f32 to vector<1x128xf32>
    %55 = arith.mulf %53, %54 : vector<1x128xf32>
    %56 = vector.broadcast %55 : vector<1x128xf32> to vector<32x128xf32>
    %57 = arith.subf %49, %56 : vector<32x128xf32>
    %58 = vector.broadcast %0 : vector<32x1xf32> to vector<32x128xf32>
    %59 = arith.mulf %57, %58 : vector<32x128xf32>
    %60 = arith.mulf %59, %59 : vector<32x128xf32>
    %cst_35 = arith.constant dense<0.000000e+00> : vector<128xf32>
    %61 = vector.multi_reduction <add>, %60, %cst_35 [0] : vector<32x128xf32> to vector<128xf32>
    %62 = vector.shape_cast %61 : vector<128xf32> to vector<1x128xf32>
    %cst_36 = arith.constant 0.0416666679 : f32
    %63 = vector.broadcast %cst_36 : f32 to vector<1x128xf32>
    %64 = arith.mulf %62, %63 : vector<1x128xf32>
    %cst_37 = arith.constant 9.99999974E-6 : f32
    %65 = vector.broadcast %cst_37 : f32 to vector<1x128xf32>
    %66 = arith.addf %64, %65 : vector<1x128xf32>
    %67 = math.rsqrt %66 : vector<1x128xf32>
    %68 = arith.mulf %13, %67 : vector<1x128xf32>
    %69 = arith.mulf %55, %68 : vector<1x128xf32>
    %70 = arith.subf %15, %69 : vector<1x128xf32>
    %71 = vector.broadcast %68 : vector<1x128xf32> to vector<32x128xf32>
    %72 = arith.mulf %49, %71 : vector<32x128xf32>
    %73 = vector.broadcast %70 : vector<1x128xf32> to vector<32x128xf32>
    %74 = arith.addf %72, %73 : vector<32x128xf32>
    %cst_38 = arith.constant 0.000000e+00 : f32
    %75 = vector.broadcast %cst_38 : f32 to vector<32x128xf32>
    %76 = arith.maximumf %74, %75 : vector<32x128xf32>
    %77 = vector.broadcast %0 : vector<32x1xf32> to vector<32x128xf32>
    %78 = arith.mulf %76, %77 : vector<32x128xf32>
    %79 = arith.truncf %78 : vector<32x128xf32> to vector<32x128xbf16>
    %c0_39 = arith.constant 0 : index
    %c0_40 = arith.constant 0 : index
    %80 = vector.load %arg0[%c0_39, %c0_40] : memref<32x32xbf16, #tpu.memory_space<vmem>>, vector<32x32xbf16>
    %c1 = arith.constant 1 : index
    %c0_41 = arith.constant 0 : index
    %c0_42 = arith.constant 0 : index
    %81 = vector.load %arg7[%c1, %c0_41, %c0_42] : memref<2x128x128xbf16, #tpu.memory_space<vmem>>, vector<1x128x128xbf16>
    %82 = vector.shape_cast %81 : vector<1x128x128xbf16> to vector<128x128xbf16>
    %c1_43 = arith.constant 1 : index
    %c0_44 = arith.constant 0 : index
    %c0_45 = arith.constant 0 : index
    %83 = vector.load %arg8[%c1_43, %c0_44, %c0_45] : memref<2x128x128xbf16, #tpu.memory_space<vmem>>, vector<1x128x128xbf16>
    %84 = vector.shape_cast %83 : vector<1x128x128xbf16> to vector<128x128xbf16>
    %c1_46 = arith.constant 1 : index
    %c0_47 = arith.constant 0 : index
    %c0_48 = arith.constant 0 : index
    %85 = vector.load %arg9[%c1_46, %c0_47, %c0_48] : memref<2x1x128xf32, #tpu.memory_space<vmem>>, vector<1x1x128xf32>
    %86 = vector.shape_cast %85 : vector<1x1x128xf32> to vector<1x128xf32>
    %c1_49 = arith.constant 1 : index
    %c0_50 = arith.constant 0 : index
    %c0_51 = arith.constant 0 : index
    %87 = vector.load %arg10[%c1_49, %c0_50, %c0_51] : memref<2x1x128xf32, #tpu.memory_space<vmem>>, vector<1x1x128xf32>
    %88 = vector.shape_cast %87 : vector<1x1x128xf32> to vector<1x128xf32>
    %c1_52 = arith.constant 1 : index
    %c0_53 = arith.constant 0 : index
    %c0_54 = arith.constant 0 : index
    %89 = vector.load %arg11[%c1_52, %c0_53, %c0_54] : memref<2x1x128xf32, #tpu.memory_space<vmem>>, vector<1x1x128xf32>
    %90 = vector.shape_cast %89 : vector<1x1x128xf32> to vector<1x128xf32>
    %c1_55 = arith.constant 1 : index
    %c0_56 = arith.constant 0 : index
    %c0_57 = arith.constant 0 : index
    %91 = vector.load %arg12[%c1_55, %c0_56, %c0_57] : memref<2x1x128xf32, #tpu.memory_space<vmem>>, vector<1x1x128xf32>
    %92 = vector.shape_cast %91 : vector<1x1x128xf32> to vector<1x128xf32>
    %cst_58 = arith.constant dense<0.000000e+00> : vector<32x128xf32>
    %93 = tpu.matmul %80, %79, %cst_58 {dimension_numbers = #tpu.dot_dimension_numbers<[1], [0], [0], [1], [0, 0, 1, 1], [], []>} : vector<32x32xbf16>, vector<32x128xbf16>, vector<32x128xf32> -> vector<32x128xf32>
    %94 = arith.truncf %93 : vector<32x128xf32> to vector<32x128xbf16>
    %cst_59 = arith.constant dense<0.000000e+00> : vector<32x128xf32>
    %95 = tpu.matmul %94, %82, %cst_59 {dimension_numbers = #tpu.dot_dimension_numbers<[1], [0], [0], [1], [0, 0, 1, 1], [], []>} : vector<32x128xbf16>, vector<128x128xbf16>, vector<32x128xf32> -> vector<32x128xf32>
    %96 = vector.broadcast %0 : vector<32x1xf32> to vector<32x128xf32>
    %97 = arith.mulf %95, %96 : vector<32x128xf32>
    %cst_60 = arith.constant dense<0.000000e+00> : vector<128xf32>
    %98 = vector.multi_reduction <add>, %97, %cst_60 [0] : vector<32x128xf32> to vector<128xf32>
    %99 = vector.shape_cast %98 : vector<128xf32> to vector<1x128xf32>
    %cst_61 = arith.constant 0.0416666679 : f32
    %100 = vector.broadcast %cst_61 : f32 to vector<1x128xf32>
    %101 = arith.mulf %99, %100 : vector<1x128xf32>
    %102 = vector.broadcast %101 : vector<1x128xf32> to vector<32x128xf32>
    %103 = arith.subf %95, %102 : vector<32x128xf32>
    %104 = vector.broadcast %0 : vector<32x1xf32> to vector<32x128xf32>
    %105 = arith.mulf %103, %104 : vector<32x128xf32>
    %106 = arith.mulf %105, %105 : vector<32x128xf32>
    %cst_62 = arith.constant dense<0.000000e+00> : vector<128xf32>
    %107 = vector.multi_reduction <add>, %106, %cst_62 [0] : vector<32x128xf32> to vector<128xf32>
    %108 = vector.shape_cast %107 : vector<128xf32> to vector<1x128xf32>
    %cst_63 = arith.constant 0.0416666679 : f32
    %109 = vector.broadcast %cst_63 : f32 to vector<1x128xf32>
    %110 = arith.mulf %108, %109 : vector<1x128xf32>
    %cst_64 = arith.constant 9.99999974E-6 : f32
    %111 = vector.broadcast %cst_64 : f32 to vector<1x128xf32>
    %112 = arith.addf %110, %111 : vector<1x128xf32>
    %113 = math.rsqrt %112 : vector<1x128xf32>
    %114 = arith.mulf %86, %113 : vector<1x128xf32>
    %115 = arith.mulf %101, %114 : vector<1x128xf32>
    %116 = arith.subf %88, %115 : vector<1x128xf32>
    %117 = vector.broadcast %114 : vector<1x128xf32> to vector<32x128xf32>
    %118 = arith.mulf %95, %117 : vector<32x128xf32>
    %119 = vector.broadcast %116 : vector<1x128xf32> to vector<32x128xf32>
    %120 = arith.addf %118, %119 : vector<32x128xf32>
    %cst_65 = arith.constant 0.000000e+00 : f32
    %121 = vector.broadcast %cst_65 : f32 to vector<32x128xf32>
    %122 = arith.maximumf %120, %121 : vector<32x128xf32>
    %123 = vector.broadcast %0 : vector<32x1xf32> to vector<32x128xf32>
    %124 = arith.mulf %122, %123 : vector<32x128xf32>
    %125 = arith.truncf %124 : vector<32x128xf32> to vector<32x128xbf16>
    %cst_66 = arith.constant dense<0.000000e+00> : vector<32x128xf32>
    %126 = tpu.matmul %125, %84, %cst_66 {dimension_numbers = #tpu.dot_dimension_numbers<[1], [0], [0], [1], [0, 0, 1, 1], [], []>} : vector<32x128xbf16>, vector<128x128xbf16>, vector<32x128xf32> -> vector<32x128xf32>
    %127 = vector.broadcast %0 : vector<32x1xf32> to vector<32x128xf32>
    %128 = arith.mulf %126, %127 : vector<32x128xf32>
    %cst_67 = arith.constant dense<0.000000e+00> : vector<128xf32>
    %129 = vector.multi_reduction <add>, %128, %cst_67 [0] : vector<32x128xf32> to vector<128xf32>
    %130 = vector.shape_cast %129 : vector<128xf32> to vector<1x128xf32>
    %cst_68 = arith.constant 0.0416666679 : f32
    %131 = vector.broadcast %cst_68 : f32 to vector<1x128xf32>
    %132 = arith.mulf %130, %131 : vector<1x128xf32>
    %133 = vector.broadcast %132 : vector<1x128xf32> to vector<32x128xf32>
    %134 = arith.subf %126, %133 : vector<32x128xf32>
    %135 = vector.broadcast %0 : vector<32x1xf32> to vector<32x128xf32>
    %136 = arith.mulf %134, %135 : vector<32x128xf32>
    %137 = arith.mulf %136, %136 : vector<32x128xf32>
    %cst_69 = arith.constant dense<0.000000e+00> : vector<128xf32>
    %138 = vector.multi_reduction <add>, %137, %cst_69 [0] : vector<32x128xf32> to vector<128xf32>
    %139 = vector.shape_cast %138 : vector<128xf32> to vector<1x128xf32>
    %cst_70 = arith.constant 0.0416666679 : f32
    %140 = vector.broadcast %cst_70 : f32 to vector<1x128xf32>
    %141 = arith.mulf %139, %140 : vector<1x128xf32>
    %cst_71 = arith.constant 9.99999974E-6 : f32
    %142 = vector.broadcast %cst_71 : f32 to vector<1x128xf32>
    %143 = arith.addf %141, %142 : vector<1x128xf32>
    %144 = math.rsqrt %143 : vector<1x128xf32>
    %145 = arith.mulf %90, %144 : vector<1x128xf32>
    %146 = arith.mulf %132, %145 : vector<1x128xf32>
    %147 = arith.subf %92, %146 : vector<1x128xf32>
    %148 = vector.broadcast %145 : vector<1x128xf32> to vector<32x128xf32>
    %149 = arith.mulf %126, %148 : vector<32x128xf32>
    %150 = vector.broadcast %147 : vector<1x128xf32> to vector<32x128xf32>
    %151 = arith.addf %149, %150 : vector<32x128xf32>
    %cst_72 = arith.constant 0.000000e+00 : f32
    %152 = vector.broadcast %cst_72 : f32 to vector<32x128xf32>
    %153 = arith.maximumf %151, %152 : vector<32x128xf32>
    %154 = vector.broadcast %0 : vector<32x1xf32> to vector<32x128xf32>
    %155 = arith.mulf %153, %154 : vector<32x128xf32>
    %156 = arith.truncf %155 : vector<32x128xf32> to vector<32x128xbf16>
    %c0_73 = arith.constant 0 : index
    %c0_74 = arith.constant 0 : index
    %157 = vector.load %arg4[%c0_73, %c0_74] : memref<16x128xbf16, #tpu.memory_space<vmem>>, vector<16x128xbf16>
    %c0_75 = arith.constant 0 : index
    %c0_76 = arith.constant 0 : index
    %158 = vector.load %arg3[%c0_75, %c0_76] : memref<16x16xbf16, #tpu.memory_space<vmem>>, vector<16x16xbf16>
    %c0_77 = arith.constant 0 : index
    %c0_78 = arith.constant 0 : index
    %c0_79 = arith.constant 0 : index
    %159 = vector.load %arg13[%c0_77, %c0_78, %c0_79] : memref<2x128x128xbf16, #tpu.memory_space<vmem>>, vector<1x128x128xbf16>
    %160 = vector.shape_cast %159 : vector<1x128x128xbf16> to vector<128x128xbf16>
    %c0_80 = arith.constant 0 : index
    %c0_81 = arith.constant 0 : index
    %c0_82 = arith.constant 0 : index
    %161 = vector.load %arg14[%c0_80, %c0_81, %c0_82] : memref<2x128x128xbf16, #tpu.memory_space<vmem>>, vector<1x128x128xbf16>
    %162 = vector.shape_cast %161 : vector<1x128x128xbf16> to vector<128x128xbf16>
    %c0_83 = arith.constant 0 : index
    %c0_84 = arith.constant 0 : index
    %c0_85 = arith.constant 0 : index
    %163 = vector.load %arg15[%c0_83, %c0_84, %c0_85] : memref<2x1x128xf32, #tpu.memory_space<vmem>>, vector<1x1x128xf32>
    %164 = vector.shape_cast %163 : vector<1x1x128xf32> to vector<1x128xf32>
    %c0_86 = arith.constant 0 : index
    %c0_87 = arith.constant 0 : index
    %c0_88 = arith.constant 0 : index
    %165 = vector.load %arg16[%c0_86, %c0_87, %c0_88] : memref<2x1x128xf32, #tpu.memory_space<vmem>>, vector<1x1x128xf32>
    %166 = vector.shape_cast %165 : vector<1x1x128xf32> to vector<1x128xf32>
    %c0_89 = arith.constant 0 : index
    %c0_90 = arith.constant 0 : index
    %c0_91 = arith.constant 0 : index
    %167 = vector.load %arg17[%c0_89, %c0_90, %c0_91] : memref<2x1x128xf32, #tpu.memory_space<vmem>>, vector<1x1x128xf32>
    %168 = vector.shape_cast %167 : vector<1x1x128xf32> to vector<1x128xf32>
    %c0_92 = arith.constant 0 : index
    %c0_93 = arith.constant 0 : index
    %c0_94 = arith.constant 0 : index
    %169 = vector.load %arg18[%c0_92, %c0_93, %c0_94] : memref<2x1x128xf32, #tpu.memory_space<vmem>>, vector<1x1x128xf32>
    %170 = vector.shape_cast %169 : vector<1x1x128xf32> to vector<1x128xf32>
    %cst_95 = arith.constant dense<0.000000e+00> : vector<16x128xf32>
    %171 = tpu.matmul %158, %157, %cst_95 {dimension_numbers = #tpu.dot_dimension_numbers<[1], [0], [0], [1], [0, 0, 1, 1], [], []>} : vector<16x16xbf16>, vector<16x128xbf16>, vector<16x128xf32> -> vector<16x128xf32>
    %172 = arith.truncf %171 : vector<16x128xf32> to vector<16x128xbf16>
    %cst_96 = arith.constant dense<0.000000e+00> : vector<16x128xf32>
    %173 = tpu.matmul %172, %160, %cst_96 {dimension_numbers = #tpu.dot_dimension_numbers<[1], [0], [0], [1], [0, 0, 1, 1], [], []>} : vector<16x128xbf16>, vector<128x128xbf16>, vector<16x128xf32> -> vector<16x128xf32>
    %174 = vector.broadcast %1 : vector<16x1xf32> to vector<16x128xf32>
    %175 = arith.mulf %173, %174 : vector<16x128xf32>
    %cst_97 = arith.constant dense<0.000000e+00> : vector<128xf32>
    %176 = vector.multi_reduction <add>, %175, %cst_97 [0] : vector<16x128xf32> to vector<128xf32>
    %177 = vector.shape_cast %176 : vector<128xf32> to vector<1x128xf32>
    %cst_98 = arith.constant 5.000000e-01 : f32
    %178 = vector.broadcast %cst_98 : f32 to vector<1x128xf32>
    %179 = arith.mulf %177, %178 : vector<1x128xf32>
    %180 = vector.broadcast %179 : vector<1x128xf32> to vector<16x128xf32>
    %181 = arith.subf %173, %180 : vector<16x128xf32>
    %182 = vector.broadcast %1 : vector<16x1xf32> to vector<16x128xf32>
    %183 = arith.mulf %181, %182 : vector<16x128xf32>
    %184 = arith.mulf %183, %183 : vector<16x128xf32>
    %cst_99 = arith.constant dense<0.000000e+00> : vector<128xf32>
    %185 = vector.multi_reduction <add>, %184, %cst_99 [0] : vector<16x128xf32> to vector<128xf32>
    %186 = vector.shape_cast %185 : vector<128xf32> to vector<1x128xf32>
    %cst_100 = arith.constant 5.000000e-01 : f32
    %187 = vector.broadcast %cst_100 : f32 to vector<1x128xf32>
    %188 = arith.mulf %186, %187 : vector<1x128xf32>
    %cst_101 = arith.constant 9.99999974E-6 : f32
    %189 = vector.broadcast %cst_101 : f32 to vector<1x128xf32>
    %190 = arith.addf %188, %189 : vector<1x128xf32>
    %191 = math.rsqrt %190 : vector<1x128xf32>
    %192 = arith.mulf %164, %191 : vector<1x128xf32>
    %193 = arith.mulf %179, %192 : vector<1x128xf32>
    %194 = arith.subf %166, %193 : vector<1x128xf32>
    %195 = vector.broadcast %192 : vector<1x128xf32> to vector<16x128xf32>
    %196 = arith.mulf %173, %195 : vector<16x128xf32>
    %197 = vector.broadcast %194 : vector<1x128xf32> to vector<16x128xf32>
    %198 = arith.addf %196, %197 : vector<16x128xf32>
    %cst_102 = arith.constant 0.000000e+00 : f32
    %199 = vector.broadcast %cst_102 : f32 to vector<16x128xf32>
    %200 = arith.maximumf %198, %199 : vector<16x128xf32>
    %201 = vector.broadcast %1 : vector<16x1xf32> to vector<16x128xf32>
    %202 = arith.mulf %200, %201 : vector<16x128xf32>
    %203 = arith.truncf %202 : vector<16x128xf32> to vector<16x128xbf16>
    %cst_103 = arith.constant dense<0.000000e+00> : vector<16x128xf32>
    %204 = tpu.matmul %203, %162, %cst_103 {dimension_numbers = #tpu.dot_dimension_numbers<[1], [0], [0], [1], [0, 0, 1, 1], [], []>} : vector<16x128xbf16>, vector<128x128xbf16>, vector<16x128xf32> -> vector<16x128xf32>
    %205 = vector.broadcast %1 : vector<16x1xf32> to vector<16x128xf32>
    %206 = arith.mulf %204, %205 : vector<16x128xf32>
    %cst_104 = arith.constant dense<0.000000e+00> : vector<128xf32>
    %207 = vector.multi_reduction <add>, %206, %cst_104 [0] : vector<16x128xf32> to vector<128xf32>
    %208 = vector.shape_cast %207 : vector<128xf32> to vector<1x128xf32>
    %cst_105 = arith.constant 5.000000e-01 : f32
    %209 = vector.broadcast %cst_105 : f32 to vector<1x128xf32>
    %210 = arith.mulf %208, %209 : vector<1x128xf32>
    %211 = vector.broadcast %210 : vector<1x128xf32> to vector<16x128xf32>
    %212 = arith.subf %204, %211 : vector<16x128xf32>
    %213 = vector.broadcast %1 : vector<16x1xf32> to vector<16x128xf32>
    %214 = arith.mulf %212, %213 : vector<16x128xf32>
    %215 = arith.mulf %214, %214 : vector<16x128xf32>
    %cst_106 = arith.constant dense<0.000000e+00> : vector<128xf32>
    %216 = vector.multi_reduction <add>, %215, %cst_106 [0] : vector<16x128xf32> to vector<128xf32>
    %217 = vector.shape_cast %216 : vector<128xf32> to vector<1x128xf32>
    %cst_107 = arith.constant 5.000000e-01 : f32
    %218 = vector.broadcast %cst_107 : f32 to vector<1x128xf32>
    %219 = arith.mulf %217, %218 : vector<1x128xf32>
    %cst_108 = arith.constant 9.99999974E-6 : f32
    %220 = vector.broadcast %cst_108 : f32 to vector<1x128xf32>
    %221 = arith.addf %219, %220 : vector<1x128xf32>
    %222 = math.rsqrt %221 : vector<1x128xf32>
    %223 = arith.mulf %168, %222 : vector<1x128xf32>
    %224 = arith.mulf %210, %223 : vector<1x128xf32>
    %225 = arith.subf %170, %224 : vector<1x128xf32>
    %226 = vector.broadcast %223 : vector<1x128xf32> to vector<16x128xf32>
    %227 = arith.mulf %204, %226 : vector<16x128xf32>
    %228 = vector.broadcast %225 : vector<1x128xf32> to vector<16x128xf32>
    %229 = arith.addf %227, %228 : vector<16x128xf32>
    %cst_109 = arith.constant 0.000000e+00 : f32
    %230 = vector.broadcast %cst_109 : f32 to vector<16x128xf32>
    %231 = arith.maximumf %229, %230 : vector<16x128xf32>
    %232 = vector.broadcast %1 : vector<16x1xf32> to vector<16x128xf32>
    %233 = arith.mulf %231, %232 : vector<16x128xf32>
    %234 = arith.truncf %233 : vector<16x128xf32> to vector<16x128xbf16>
    %c0_110 = arith.constant 0 : index
    %c0_111 = arith.constant 0 : index
    %235 = vector.load %arg3[%c0_110, %c0_111] : memref<16x16xbf16, #tpu.memory_space<vmem>>, vector<16x16xbf16>
    %c1_112 = arith.constant 1 : index
    %c0_113 = arith.constant 0 : index
    %c0_114 = arith.constant 0 : index
    %236 = vector.load %arg13[%c1_112, %c0_113, %c0_114] : memref<2x128x128xbf16, #tpu.memory_space<vmem>>, vector<1x128x128xbf16>
    %237 = vector.shape_cast %236 : vector<1x128x128xbf16> to vector<128x128xbf16>
    %c1_115 = arith.constant 1 : index
    %c0_116 = arith.constant 0 : index
    %c0_117 = arith.constant 0 : index
    %238 = vector.load %arg14[%c1_115, %c0_116, %c0_117] : memref<2x128x128xbf16, #tpu.memory_space<vmem>>, vector<1x128x128xbf16>
    %239 = vector.shape_cast %238 : vector<1x128x128xbf16> to vector<128x128xbf16>
    %c1_118 = arith.constant 1 : index
    %c0_119 = arith.constant 0 : index
    %c0_120 = arith.constant 0 : index
    %240 = vector.load %arg15[%c1_118, %c0_119, %c0_120] : memref<2x1x128xf32, #tpu.memory_space<vmem>>, vector<1x1x128xf32>
    %241 = vector.shape_cast %240 : vector<1x1x128xf32> to vector<1x128xf32>
    %c1_121 = arith.constant 1 : index
    %c0_122 = arith.constant 0 : index
    %c0_123 = arith.constant 0 : index
    %242 = vector.load %arg16[%c1_121, %c0_122, %c0_123] : memref<2x1x128xf32, #tpu.memory_space<vmem>>, vector<1x1x128xf32>
    %243 = vector.shape_cast %242 : vector<1x1x128xf32> to vector<1x128xf32>
    %c1_124 = arith.constant 1 : index
    %c0_125 = arith.constant 0 : index
    %c0_126 = arith.constant 0 : index
    %244 = vector.load %arg17[%c1_124, %c0_125, %c0_126] : memref<2x1x128xf32, #tpu.memory_space<vmem>>, vector<1x1x128xf32>
    %245 = vector.shape_cast %244 : vector<1x1x128xf32> to vector<1x128xf32>
    %c1_127 = arith.constant 1 : index
    %c0_128 = arith.constant 0 : index
    %c0_129 = arith.constant 0 : index
    %246 = vector.load %arg18[%c1_127, %c0_128, %c0_129] : memref<2x1x128xf32, #tpu.memory_space<vmem>>, vector<1x1x128xf32>
    %247 = vector.shape_cast %246 : vector<1x1x128xf32> to vector<1x128xf32>
    %cst_130 = arith.constant dense<0.000000e+00> : vector<16x128xf32>
    %248 = tpu.matmul %235, %234, %cst_130 {dimension_numbers = #tpu.dot_dimension_numbers<[1], [0], [0], [1], [0, 0, 1, 1], [], []>} : vector<16x16xbf16>, vector<16x128xbf16>, vector<16x128xf32> -> vector<16x128xf32>
    %249 = arith.truncf %248 : vector<16x128xf32> to vector<16x128xbf16>
    %cst_131 = arith.constant dense<0.000000e+00> : vector<16x128xf32>
    %250 = tpu.matmul %249, %237, %cst_131 {dimension_numbers = #tpu.dot_dimension_numbers<[1], [0], [0], [1], [0, 0, 1, 1], [], []>} : vector<16x128xbf16>, vector<128x128xbf16>, vector<16x128xf32> -> vector<16x128xf32>
    %251 = vector.broadcast %1 : vector<16x1xf32> to vector<16x128xf32>
    %252 = arith.mulf %250, %251 : vector<16x128xf32>
    %cst_132 = arith.constant dense<0.000000e+00> : vector<128xf32>
    %253 = vector.multi_reduction <add>, %252, %cst_132 [0] : vector<16x128xf32> to vector<128xf32>
    %254 = vector.shape_cast %253 : vector<128xf32> to vector<1x128xf32>
    %cst_133 = arith.constant 5.000000e-01 : f32
    %255 = vector.broadcast %cst_133 : f32 to vector<1x128xf32>
    %256 = arith.mulf %254, %255 : vector<1x128xf32>
    %257 = vector.broadcast %256 : vector<1x128xf32> to vector<16x128xf32>
    %258 = arith.subf %250, %257 : vector<16x128xf32>
    %259 = vector.broadcast %1 : vector<16x1xf32> to vector<16x128xf32>
    %260 = arith.mulf %258, %259 : vector<16x128xf32>
    %261 = arith.mulf %260, %260 : vector<16x128xf32>
    %cst_134 = arith.constant dense<0.000000e+00> : vector<128xf32>
    %262 = vector.multi_reduction <add>, %261, %cst_134 [0] : vector<16x128xf32> to vector<128xf32>
    %263 = vector.shape_cast %262 : vector<128xf32> to vector<1x128xf32>
    %cst_135 = arith.constant 5.000000e-01 : f32
    %264 = vector.broadcast %cst_135 : f32 to vector<1x128xf32>
    %265 = arith.mulf %263, %264 : vector<1x128xf32>
    %cst_136 = arith.constant 9.99999974E-6 : f32
    %266 = vector.broadcast %cst_136 : f32 to vector<1x128xf32>
    %267 = arith.addf %265, %266 : vector<1x128xf32>
    %268 = math.rsqrt %267 : vector<1x128xf32>
    %269 = arith.mulf %241, %268 : vector<1x128xf32>
    %270 = arith.mulf %256, %269 : vector<1x128xf32>
    %271 = arith.subf %243, %270 : vector<1x128xf32>
    %272 = vector.broadcast %269 : vector<1x128xf32> to vector<16x128xf32>
    %273 = arith.mulf %250, %272 : vector<16x128xf32>
    %274 = vector.broadcast %271 : vector<1x128xf32> to vector<16x128xf32>
    %275 = arith.addf %273, %274 : vector<16x128xf32>
    %cst_137 = arith.constant 0.000000e+00 : f32
    %276 = vector.broadcast %cst_137 : f32 to vector<16x128xf32>
    %277 = arith.maximumf %275, %276 : vector<16x128xf32>
    %278 = vector.broadcast %1 : vector<16x1xf32> to vector<16x128xf32>
    %279 = arith.mulf %277, %278 : vector<16x128xf32>
    %280 = arith.truncf %279 : vector<16x128xf32> to vector<16x128xbf16>
    %cst_138 = arith.constant dense<0.000000e+00> : vector<16x128xf32>
    %281 = tpu.matmul %280, %239, %cst_138 {dimension_numbers = #tpu.dot_dimension_numbers<[1], [0], [0], [1], [0, 0, 1, 1], [], []>} : vector<16x128xbf16>, vector<128x128xbf16>, vector<16x128xf32> -> vector<16x128xf32>
    %282 = vector.broadcast %1 : vector<16x1xf32> to vector<16x128xf32>
    %283 = arith.mulf %281, %282 : vector<16x128xf32>
    %cst_139 = arith.constant dense<0.000000e+00> : vector<128xf32>
    %284 = vector.multi_reduction <add>, %283, %cst_139 [0] : vector<16x128xf32> to vector<128xf32>
    %285 = vector.shape_cast %284 : vector<128xf32> to vector<1x128xf32>
    %cst_140 = arith.constant 5.000000e-01 : f32
    %286 = vector.broadcast %cst_140 : f32 to vector<1x128xf32>
    %287 = arith.mulf %285, %286 : vector<1x128xf32>
    %288 = vector.broadcast %287 : vector<1x128xf32> to vector<16x128xf32>
    %289 = arith.subf %281, %288 : vector<16x128xf32>
    %290 = vector.broadcast %1 : vector<16x1xf32> to vector<16x128xf32>
    %291 = arith.mulf %289, %290 : vector<16x128xf32>
    %292 = arith.mulf %291, %291 : vector<16x128xf32>
    %cst_141 = arith.constant dense<0.000000e+00> : vector<128xf32>
    %293 = vector.multi_reduction <add>, %292, %cst_141 [0] : vector<16x128xf32> to vector<128xf32>
    %294 = vector.shape_cast %293 : vector<128xf32> to vector<1x128xf32>
    %cst_142 = arith.constant 5.000000e-01 : f32
    %295 = vector.broadcast %cst_142 : f32 to vector<1x128xf32>
    %296 = arith.mulf %294, %295 : vector<1x128xf32>
    %cst_143 = arith.constant 9.99999974E-6 : f32
    %297 = vector.broadcast %cst_143 : f32 to vector<1x128xf32>
    %298 = arith.addf %296, %297 : vector<1x128xf32>
    %299 = math.rsqrt %298 : vector<1x128xf32>
    %300 = arith.mulf %245, %299 : vector<1x128xf32>
    %301 = arith.mulf %287, %300 : vector<1x128xf32>
    %302 = arith.subf %247, %301 : vector<1x128xf32>
    %303 = vector.broadcast %300 : vector<1x128xf32> to vector<16x128xf32>
    %304 = arith.mulf %281, %303 : vector<16x128xf32>
    %305 = vector.broadcast %302 : vector<1x128xf32> to vector<16x128xf32>
    %306 = arith.addf %304, %305 : vector<16x128xf32>
    %cst_144 = arith.constant 0.000000e+00 : f32
    %307 = vector.broadcast %cst_144 : f32 to vector<16x128xf32>
    %308 = arith.maximumf %306, %307 : vector<16x128xf32>
    %309 = vector.broadcast %1 : vector<16x1xf32> to vector<16x128xf32>
    %310 = arith.mulf %308, %309 : vector<16x128xf32>
    %311 = arith.truncf %310 : vector<16x128xf32> to vector<16x128xbf16>
    %c0_145 = arith.constant 0 : index
    %c0_146 = arith.constant 0 : index
    %312 = vector.load %arg6[%c0_145, %c0_146] : memref<16x32xbf16, #tpu.memory_space<vmem>>, vector<16x32xbf16>
    %cst_147 = arith.constant dense<0.000000e+00> : vector<16x128xf32>
    %313 = tpu.matmul %312, %156, %cst_147 {dimension_numbers = #tpu.dot_dimension_numbers<[1], [0], [0], [1], [0, 0, 1, 1], [], []>} : vector<16x32xbf16>, vector<32x128xbf16>, vector<16x128xf32> -> vector<16x128xf32>
    %314 = arith.extf %311 : vector<16x128xbf16> to vector<16x128xf32>
    %315 = arith.mulf %313, %313 : vector<16x128xf32>
    %cst_148 = arith.constant dense<0.000000e+00> : vector<16xf32>
    %316 = vector.multi_reduction <add>, %315, %cst_148 [1] : vector<16x128xf32> to vector<16xf32>
    %317 = vector.shape_cast %316 : vector<16xf32> to vector<16x1xf32>
    %318 = math.sqrt %317 : vector<16x1xf32>
    %cst_149 = arith.constant 9.99999996E-13 : f32
    %319 = vector.broadcast %cst_149 : f32 to vector<16x1xf32>
    %320 = arith.maximumf %318, %319 : vector<16x1xf32>
    %321 = vector.broadcast %320 : vector<16x1xf32> to vector<16x128xf32>
    %322 = arith.divf %313, %321 : vector<16x128xf32>
    %323 = arith.mulf %314, %314 : vector<16x128xf32>
    %cst_150 = arith.constant dense<0.000000e+00> : vector<16xf32>
    %324 = vector.multi_reduction <add>, %323, %cst_150 [1] : vector<16x128xf32> to vector<16xf32>
    %325 = vector.shape_cast %324 : vector<16xf32> to vector<16x1xf32>
    %326 = math.sqrt %325 : vector<16x1xf32>
    %cst_151 = arith.constant 9.99999996E-13 : f32
    %327 = vector.broadcast %cst_151 : f32 to vector<16x1xf32>
    %328 = arith.maximumf %326, %327 : vector<16x1xf32>
    %329 = vector.broadcast %328 : vector<16x1xf32> to vector<16x128xf32>
    %330 = arith.divf %314, %329 : vector<16x128xf32>
    %331 = arith.mulf %322, %330 : vector<16x128xf32>
    %cst_152 = arith.constant dense<0.000000e+00> : vector<16xf32>
    %332 = vector.multi_reduction <add>, %331, %cst_152 [1] : vector<16x128xf32> to vector<16xf32>
    %333 = vector.shape_cast %332 : vector<16xf32> to vector<16x1xf32>
    %cst_153 = arith.constant 1.000000e+00 : f32
    %334 = vector.broadcast %cst_153 : f32 to vector<16x1xf32>
    %335 = arith.subf %334, %333 : vector<16x1xf32>
    %336 = arith.mulf %335, %1 : vector<16x1xf32>
    %cst_154 = arith.constant dense<0.000000e+00> : vector<1xf32>
    %337 = vector.multi_reduction <add>, %336, %cst_154 [0] : vector<16x1xf32> to vector<1xf32>
    %338 = vector.shape_cast %337 : vector<1xf32> to vector<1x1xf32>
    %cst_155 = arith.constant 5.000000e-01 : f32
    %339 = vector.broadcast %cst_155 : f32 to vector<1x1xf32>
    %340 = arith.mulf %338, %339 : vector<1x1xf32>
    %c0_156 = arith.constant 0 : index
    %c0_157 = arith.constant 0 : index
    %341 = vector.load %arg19[%c0_156, %c0_157] : memref<1x1xf32, #tpu.memory_space<vmem>>, vector<1x1xf32>
    tpu.vector_store %arg19[%c0_156, %c0_157], %340 {strides = array<i32>} : memref<1x1xf32, #tpu.memory_space<vmem>>, vector<1x1xf32>,
    return
  }
}

</mosaic_0001>

<bundles_post_ra>
// kernel: tpu_custom_call.1
= control target key start
LH: loop header
LB: loop body
LE: loop exit
PB: predicated region body
PF: predicated region fallthrough
CT: control target
= control target key end

     0   :  { %s3057_s0 = inlined_call_operand.vmem [shape: bf16[32,32], index: 0, kind: input, shape index: {}]   ;;  %s3058_s1 = inlined_call_operand.vmem [shape: bf16[32,128], index: 1, kind: input, shape index: {}]   ;;  %s3059_s2 = inlined_call_operand.vmem [shape: f32[32,1], index: 2, kind: input, shape index: {}]   ;;  %s3060_s3 = inlined_call_operand.vmem [shape: bf16[16,16], index: 3, kind: input, shape index: {}]   ;;  %s3061_s4 = inlined_call_operand.vmem [shape: bf16[16,128], index: 4, kind: input, shape index: {}]   ;;  %s3062_s5 = inlined_call_operand.vmem [shape: f32[16,1], index: 5, kind: input, shape index: {}]   ;;  %s3063_s6 = inlined_call_operand.vmem [shape: bf16[16,32], index: 6, kind: input, shape index: {}]   ;;  %s3064_s7 = inlined_call_operand.hbm [shape: bf16[2,128,128], index: 7, kind: input, shape index: {}]   ;;  %s3065_s8 = inlined_call_operand.hbm [shape: bf16[2,128,128], index: 8, kind: input, shape index: {}]   ;;  %s3066_s9 = inlined_call_operand.vmem [shape: f32[2,1,128], index: 9, kind: input, shape index: {}]   ;;  %s3067_s10 = inlined_call_operand.vmem [shape: f32[2,1,128], index: 10, kind: input, shape index: {}]   ;;  %s3068_s11 = inlined_call_operand.vmem [shape: f32[2,1,128], index: 11, kind: input, shape index: {}]   ;;  %s3069_s12 = inlined_call_operand.vmem [shape: f32[2,1,128], index: 12, kind: input, shape index: {}]   ;;  %s3070_s13 = inlined_call_operand.hbm [shape: bf16[2,128,128], index: 13, kind: input, shape index: {}]   ;;  %s3071_s14 = inlined_call_operand.hbm [shape: bf16[2,128,128], index: 14, kind: input, shape index: {}]   ;;  %s3072_s15 = inlined_call_operand.vmem [shape: f32[2,1,128], index: 15, kind: input, shape index: {}]   ;;  %s3073_s16 = inlined_call_operand.vmem [shape: f32[2,1,128], index: 16, kind: input, shape index: {}]   ;;  %s3074_s17 = inlined_call_operand.vmem [shape: f32[2,1,128], index: 17, kind: input, shape index: {}]   ;;  %s3075_s18 = inlined_call_operand.vmem [shape: f32[2,1,128], index: 18, kind: input, shape index: {}]   ;;  %s3076_s19 = inlined_call_operand.hbm [shape: f32[1,1], index: 19, kind: output, shape index: {}]  }
   0x1   :  { %3080 = sst [smem:[#allocation15_spill]] %s3057_s0 }
   0x2   :  { %3081 = sst [smem:[#allocation16_spill]] %s3058_s1 }
   0x3   :  { %3082 = sst [smem:[#allocation17_spill]] %s3059_s2 }
   0x4   :  { %3083 = sst [smem:[#allocation18_spill]] %s3060_s3 }
   0x5   :  { %24 = vsyncpa [#allocation3], 0 }
   0x6   :  { %25 = vsyncpa [#allocation6], 0 }
   0x7   :  { %26 = vsyncpa [#allocation9], 0 }
   0x8   :  { %27 = vsyncpa [#allocation4], 0  ;;  %s2534_s0 = smov [#allocation5]   ;;  %s2535_s20 = smov [#allocation2]  }
   0x9   :  { %s59_s30 = sshll.u32 %s2534_s0, 4  ;;  %s47_s21 = sshll.u32 %s2535_s20, 4  ;;  %s60_s30 = int_to_ptr.vmem [resolvable:$true] %s59_s30  ;;  %s2644_s21 = int_to_ptr.vmem [resolvable:$true] %s47_s21 }
   0xa   :  { %s2416_s2 = scalar_lea.hbm %s3065_s8, 2048 }
   0xb   :  { %p2417_p0 = scmp.ne.s32.totalorder %s3065_s8, %s2416_s2  ;;  %p2420_p1 = scmp.lt.u32.totalorder %s2416_s2, %s3065_s8 }
   0xd   :  { %p2422_p2 = pnand %p2420_p1, %p2417_p0 }
   0xf   :  { %2425 = shalt.err (!%p2422_p2)
}
  0x10   :  { %s2426_s26 = scalar_lea.vmem %s60_s30, 2048  ;;  %p2431_p4 = scmp.lt.s32.totalorder %s60_s30, %s60_s30 }
  0x11   :  { %p2427_p3 = scmp.ne.s32.totalorder %s60_s30, %s2426_s26  ;;  %p2432_p5 = scmp.lt.s32.totalorder %s2426_s26, %s2426_s26 }
  0x13   :  { %p2433_p6 = por %p2432_p5, %p2431_p4 }
  0x15   :  { %p2434_p7 = pnand %p2433_p6, %p2427_p3 }
  0x17   :  { %2437 = shalt.err (!%p2434_p7)
}
  0x18   :  { %s2536_s27 = smov 64   ;;  %s2537_s28 = smov 4  }
  0x19   :  { %65 = dma.hbm_to_vmem [thread:$0]  %s3065_s8, 2048, %s60_s30, [#allocation6], %s2536_s27, %s2536_s27, %s2537_s28  }
  0x1a   :  { %s2438_s22 = scalar_lea.hbm %s3064_s7, 2048 }
  0x1b   :  { %p2439_p8 = scmp.ne.s32.totalorder %s3064_s7, %s2438_s22  ;;  %p2442_p9 = scmp.lt.u32.totalorder %s2438_s22, %s3064_s7 }
  0x1d   :  { %p2444_p10 = pnand %p2442_p9, %p2439_p8 }
  0x1f   :  { %2447 = shalt.err (!%p2444_p10)
}
  0x20   :  { %s2448_s3 = scalar_lea.vmem %s2644_s21, 2048  ;;  %p2453_p12 = scmp.lt.s32.totalorder %s2644_s21, %s2644_s21 }
  0x21   :  { %p2449_p11 = scmp.ne.s32.totalorder %s2644_s21, %s2448_s3  ;;  %p2454_p13 = scmp.lt.s32.totalorder %s2448_s3, %s2448_s3 }
  0x23   :  { %p2455_p0 = por %p2454_p13, %p2453_p12 }
  0x25   :  { %p2456_p1 = pnand %p2455_p0, %p2449_p11 }
  0x27   :  { %2459 = shalt.err (!%p2456_p1)
}
  0x28   :  { %53 = dma.hbm_to_vmem [thread:$0]  %s3064_s7, 2048, %s2644_s21, [#allocation3], %s2536_s27, %s2536_s27, %s2537_s28  }
  0x29   :  { %s2538_s26 = smov [#allocation7]   ;;  %s2539_s0 = smov [#allocation8]  }
  0x2a   :  { %s79_s29 = sshll.u32 %s2538_s26, 4  ;;  %s91_s20 = sshll.u32 %s2539_s0, 4  ;;  %s80_s29 = int_to_ptr.vmem [resolvable:$true] %s79_s29  ;;  %s2681_s20 = int_to_ptr.vmem [resolvable:$true] %s91_s20 }
  0x2b   :  { %s2460_s2 = scalar_lea.hbm %s3070_s13, 2048 }
  0x2c   :  { %p2461_p2 = scmp.ne.s32.totalorder %s3070_s13, %s2460_s2  ;;  %p2464_p3 = scmp.lt.u32.totalorder %s2460_s2, %s3070_s13 }
  0x2e   :  { %p2466_p4 = pnand %p2464_p3, %p2461_p2 }
  0x30   :  { %2469 = shalt.err (!%p2466_p4)
}
  0x31   :  { %s2470_s7 = scalar_lea.vmem %s80_s29, 2048  ;;  %p2475_p6 = scmp.lt.s32.totalorder %s80_s29, %s80_s29 }
  0x32   :  { %p2471_p5 = scmp.ne.s32.totalorder %s80_s29, %s2470_s7  ;;  %p2476_p7 = scmp.lt.s32.totalorder %s2470_s7, %s2470_s7 }
  0x34   :  { %p2477_p8 = por %p2476_p7, %p2475_p6 }
  0x36   :  { %p2478_p9 = pnand %p2477_p8, %p2471_p5 }
  0x38   :  { %2481 = shalt.err (!%p2478_p9)
}
  0x39   :  { %85 = dma.hbm_to_vmem [thread:$0]  %s3070_s13, 2048, %s80_s29, [#allocation6], %s2536_s27, %s2536_s27, %s2537_s28  }
  0x3a   :  { %s2482_s0 = scalar_lea.hbm %s3071_s14, 2048 }
  0x3b   :  { %p2483_p10 = scmp.ne.s32.totalorder %s3071_s14, %s2482_s0  ;;  %p2486_p11 = scmp.lt.u32.totalorder %s2482_s0, %s3071_s14 }
  0x3d   :  { %p2488_p12 = pnand %p2486_p11, %p2483_p10 }
  0x3f   :  { %2491 = shalt.err (!%p2488_p12)
}
  0x40   :  { %s2492_s24 = scalar_lea.vmem %s2681_s20, 2048  ;;  %p2497_p0 = scmp.lt.s32.totalorder %s2681_s20, %s2681_s20 }
  0x41   :  { %p2493_p13 = scmp.ne.s32.totalorder %s2681_s20, %s2492_s24  ;;  %p2498_p1 = scmp.lt.s32.totalorder %s2492_s24, %s2492_s24 }
  0x43   :  { %p2499_p2 = por %p2498_p1, %p2497_p0 }
  0x45   :  { %p2500_p3 = pnand %p2499_p2, %p2493_p13 }
  0x47   :  { %2503 = shalt.err (!%p2500_p3)
}
  0x48   :  { %97 = dma.hbm_to_vmem [thread:$0]  %s3071_s14, 2048, %s2681_s20, [#allocation9], %s2536_s27, %s2536_s27, %s2537_s28  }
  0x49   :  { %2526 = dma.done.wait [#allocation3], 2048  }
  0x4a   :  { %2527 = vsyncadd [#allocation3], 4294965248 }
  0x4b   :  { %2528 = dma.done.wait [#allocation6], 4096  }
  0x4c   :  { %2529 = vsyncadd [#allocation6], 4294963200 }
  0x4d   :  { %2530 = dma.done.wait [#allocation9], 2048  }
  0x4e   :  { %2531 = vsyncadd [#allocation9], 4294965248  ;;  %s3084_s7 = sld [smem:[#allocation16_spill]]  ;;  %vm191_vm0 = vcmask 261120   ;;  %s3085_s0 = sld [smem:[#allocation15_spill]]  ;;  %v2315_v3 = vld [vmem:[#allocation2] sm:$0xff]  }
  0x4f   :  { %v2316_v4 = vld [vmem:[#allocation2 + $0x8] sm:$0xff]   ;;  %2111 = vmatprep.subr.bf16.mxu1 %v2315_v3  ;;  %v2317_v6 = vld [vmem:[#allocation2 + $0x10] sm:$0xff]   ;;  %v2318_v7 = vld [vmem:[#allocation2 + $0x18] sm:$0xff]   ;;  %s3086_s1 = sld [smem:[#allocation17_spill]]  ;;  %v2540_v14 = vmov 0   ;;  %vm2542_vm1 = vmmov 0  }
  0x50   :  { %2112 = vmatpush3.bf16.msra.mxu1 %v2315_v3  ;;  %v2319_v8 = vld [vmem:[#allocation2 + $0x20] sm:$0xff]   ;;  %v2320_v9 = vld [vmem:[#allocation2 + $0x28] sm:$0xff]   ;;  %v2321_v10 = vld [vmem:[#allocation2 + $0x30] sm:$0xff]   ;;  %2309 = vset.pattern.permute.xlu0 %v2540_v14  ;;  %s3087_s24 = sld [smem:[#allocation18_spill]]  ;;  %vm1085_vm2 = vcmask 130048   ;;  %vm1896_vm11 = vcmask 7168  }
  0x51   :  { %2113 = vmatprep.subr.bf16.mxu1 %v2316_v4  ;;  %v2322_v11 = vld [vmem:[#allocation2 + $0x38] sm:$0xff]   ;;  %2310 = vset.pattern.permute.xlu1 %v2540_v14  ;;  %v123_v17 = vld [vmem:[%s3062_s5] sm:$0xff]  ;;  %v124_v18 = vld [vmem:[%s3062_s5 + $0x8] sm:$0xff]  ;;  %s2543_s13 = smov [#allocation10]   ;;  %vm1907_vm12 = vcmask 0  }
  0x52   :  { %v2323_v25 = vld [vmem:[#allocation5] sm:$0xff]   ;;  %v2324_v26 = vld [vmem:[#allocation5 + $0x8] sm:$0xff]   ;;  %v2325_v27 = vld [vmem:[#allocation5 + $0x10] sm:$0xff]   ;;  %s1915_s29 = sshll.u32 %s2543_s13, 4  ;;  %s1916_s29 = int_to_ptr.vmem [resolvable:$true] %s1915_s29 }
  0x53   :  { %v2326_v28 = vld [vmem:[#allocation5 + $0x18] sm:$0xff]   ;;  %v2327_v29 = vld [vmem:[#allocation5 + $0x20] sm:$0xff]   ;;  %v2328_v30 = vld [vmem:[#allocation5 + $0x28] sm:$0xff]   ;;  %s2504_s25 = scalar_lea.vmem %s1916_s29, 16  ;;  %p2509_p5 = scmp.lt.s32.totalorder %s1916_s29, %s1916_s29 }
  0x54   :  { %v2311_v0 = vld [vmem:[%s3084_s7] sm:$0xff]   ;;  %v2312_v1 = vld [vmem:[%s3084_s7 + $0x8] sm:$0xff]   ;;  %2114 = vmatpush3.bf16.msra.mxu1 %v2316_v4  ;;  %v2329_v31 = vld [vmem:[#allocation5 + $0x30] sm:$0xff]   ;;  %p2505_p4 = scmp.ne.s32.totalorder %s1916_s29, %s2504_s25 }
  0x55   :  { %2103 = vmatprep.subr.bf16.mxu0 %v2311_v0  ;;  %v2313_v2 = vld [vmem:[%s3085_s0] sm:$0xff]   ;;  %v2731_v5 = vld [vmem:[%s3085_s0 + $0x8] sm:$0xff]   ;;  %2115 = vmatprep.subr.bf16.mxu1 %v2317_v6  ;;  %v121_v13 = vld [vmem:[%s3086_s1 + $0x10] sm:$0xff] }
  0x56   :  { %2104 = vmatpush3.bf16.msra.mxu0 %v2311_v0  ;;  %2107 = vmatprep.mubr.msk.bf16.mxu0 %vm191_vm0, %v2313_v2  ;;  %v119_v12 = vld [vmem:[%s3086_s1] sm:$0xff]  ;;  %v120_v15 = vld [vmem:[%s3086_s1 + $0x8] sm:$0xff]  ;;  %v122_v16 = vld [vmem:[%s3086_s1 + $0x18] sm:$0xff] }
  0x57   :  { %2105 = vmatprep.subr.bf16.mxu0 %v2312_v1  ;;  %348 = vperm.xlu0 %2309, %v119_v12   ;;  %v2330_v32 = vld [vmem:[#allocation5 + $0x38] sm:$0xff]  }
  0x58   :  { %2116 = vmatpush3.bf16.msra.mxu1 %v2317_v6  ;;  %358 = vperm.xlu1 %2310, %v121_v13  }
  0x59   :  { %2117 = vmatprep.subr.bf16.mxu1 %v2318_v7 }
  0x5a   :  { %2106 = vmatpush3.bf16.msra.mxu0 %v2312_v1 }
  0x5b   :  { %353 = vperm.xlu0 %2309, %v120_v15   ;;  %2131 = vmatprep.subr.bf16.mxu0 %v2323_v25  ;;  %v408_v15 = vlaneseq }
  0x5c   :  { %2118 = vmatpush3.bf16.msra.mxu1 %v2318_v7  ;;  %363 = vperm.xlu1 %2310, %v122_v16  }
  0x5d   :  { %2108 = vmatmul.mubr.msk.bf16.vlgmr.msra.gmra.mrb[0].mxu0 %vm191_vm0, %v2731_v5  ;;  %2119 = vmatprep.subr.bf16.mxu1 %v2319_v8  ;;  %v409_v16 = vshrl.u32 %v408_v15, 7 }
  0x5e   :  { %2132 = vmatpush3.bf16.msra.mxu0 %v2323_v25 }
  0x5f   :  { %1222 = vperm.xlu0 %2309, %v123_v17   ;;  %2133 = vmatprep.subr.bf16.mxu0 %v2324_v26  ;;  %v165_v17 = vld [vmem:[%s3066_s9] sm:$0x1] }
  0x60   :  { %2120 = vmatpush3.bf16.msra.mxu1 %v2319_v8  ;;  %1227 = vperm.xlu1 %2310, %v124_v18   ;;  %v2773_v18 = vsub.s32 0, %v409_v16 }
  0x61   :  { %2121 = vmatprep.subr.bf16.mxu1 %v2320_v9 }
  0x62   :  { %2134 = vmatpush3.bf16.msra.mxu0 %v2324_v26 }
  0x63   :  { %2135 = vmatprep.subr.bf16.mxu0 %v2325_v27 }
  0x64   :  { %2122 = vmatpush3.bf16.msra.mxu1 %v2320_v9 }
  0x65   :  { %2123 = vmatprep.subr.bf16.mxu1 %v2321_v10 }
  0x66   :  { %2136 = vmatpush3.bf16.msra.mxu0 %v2325_v27 }
  0x67   :  { %2137 = vmatprep.subr.bf16.mxu0 %v2326_v28 }
  0x68   :  { %2124 = vmatpush3.bf16.msra.mxu1 %v2321_v10 }
  0x69   :  { %2125 = vmatprep.subr.bf16.mxu1 %v2322_v11 }
  0x6a   :  { %2138 = vmatpush3.bf16.msra.mxu0 %v2326_v28 }
  0x6b   :  { %2139 = vmatprep.subr.bf16.mxu0 %v2327_v29 }
  0x6c   :  { %2126 = vmatpush3.bf16.msra.mxu1 %v2322_v11 }
  0x6e   :  { %2140 = vmatpush3.bf16.msra.mxu0 %v2327_v29 }
  0x6f   :  { %2141 = vmatprep.subr.bf16.mxu0 %v2328_v30 }
  0x72   :  { %2142 = vmatpush3.bf16.msra.mxu0 %v2328_v30 }
  0x73   :  { %2143 = vmatprep.subr.bf16.mxu0 %v2329_v31 }
  0x76   :  { %2144 = vmatpush3.bf16.msra.mxu0 %v2329_v31 }
  0x77   :  { %2145 = vmatprep.subr.bf16.mxu0 %v2330_v32 }
  0x7a   :  { %2146 = vmatpush3.bf16.msra.mxu0 %v2330_v32 }
  0xd6   :  { %v2754_v33 = vpop.permute.xlu0 %348 }
  0xd7   :  { %v2756_v35 = vpop.permute.xlu1 %358 }
  0xda   :  { %v2758_v38 = vpop.permute.xlu0 %353 }
  0xdb   :  { %v2763_v44 = vpop.permute.xlu1 %363 }
 0x130   :  { %v2109_v19 = vpop.f32.mrb[0].mxu0 }
 0x131   :  { %v232_v20 = vpop.f32.mrb[1].mxu0 }
 0x132   :  { %v2110_v21 = vpop.f32.mrb[2].mxu0 }
 0x133   :  { %v248_v22 = vpack.c.bf16 %v2110_v21, %v2109_v19  ;;  %v235_v23 = vpop.f32.mrb[3].mxu0  ;;  %v166_v21 = vld [vmem:[%s3067_s10] sm:$0x1] }
 0x134   :  { %v247_v24 = vpack.c.bf16 %v235_v23, %v232_v20 }
 0x136   :  { %2127 = vmatprep.mubr.bf16.mxu1 %v247_v24 }
 0x137   :  { %2128 = vmatmul.mubr.bf16.vlgmr.msra.gmra.mrb[0].mxu1 %v248_v22 }
 0x138   :  { %2155 = vmatprep.mubr.msk.bf16.mxu1 %vm191_vm0, %v2313_v2 }
 0x20a   :  { %v2129_v34 = vpop.f32.mrb[0].mxu1 }
 0x20b   :  { %v331_v36 = vpop.f32.mrb[1].mxu1  ;;  %v368_v42 = vmul.f32 %v2129_v34, %v2756_v35 }
 0x20c   :  { %v2130_v37 = vpop.f32.mrb[2].mxu1  ;;  %v366_v40 = vmul.f32 %v2754_v33, %v331_v36 }
 0x20d   :  { %v334_v39 = vpop.f32.mrb[3].mxu1  ;;  %v369_v45 = vmul.f32 %v2130_v37, %v2763_v44 }
 0x20e   :  { %v367_v41 = vmul.f32 %v2758_v38, %v334_v39 }
 0x210   :  { %v370_v43 = vadd.f32 %v367_v41, %v366_v40 }
 0x212   :  { %v371_v46 = vadd.f32 %v370_v43, %v368_v42 }
 0x214   :  { %v372_v47 = vadd.f32 %v371_v46, %v369_v45 }
 0x216   :  { %v373_v48 = vrot.slane %v372_v47, 4 }
 0x218   :  { %v374_v49 = vadd.f32 %v373_v48, %v372_v47 }
 0x21a   :  { %v375_v50 = vrot.slane %v374_v49, 2 }
 0x21c   :  { %v376_v51 = vadd.f32 %v375_v50, %v374_v49  ;;  %v2332_v49 = vld [vmem:[#allocation2 + $0x48] sm:$0xff]   ;;  %v2333_v50 = vld [vmem:[#allocation2 + $0x50] sm:$0xff]  }
 0x21e   :  { %v377_v52 = vrot.slane %v376_v51, 1 }
 0x220   :  { %v378_v53 = vadd.f32 %v377_v52, %v376_v51  ;;  %v2334_v51 = vld [vmem:[#allocation2 + $0x58] sm:$0xff]   ;;  %v2335_v52 = vld [vmem:[#allocation2 + $0x60] sm:$0xff]  }
 0x222   :  { %v379_v54 = vmul.f32 0.041666668, %v378_v53  ;;  %v2336_v53 = vld [vmem:[#allocation2 + $0x68] sm:$0xff]  }
 0x224   :  { %v380_v55 = vsub.f32 %v331_v36, %v379_v54  ;;  %v381_v56 = vsub.f32 %v334_v39, %v379_v54  ;;  %v382_v57 = vsub.f32 %v2129_v34, %v379_v54  ;;  %v383_v58 = vsub.f32 %v2130_v37, %v379_v54 }
 0x226   :  { %v384_v59 = vmul.f32 %v380_v55, %v2754_v33  ;;  %v385_v60 = vmul.f32 %v381_v56, %v2758_v38  ;;  %v386_v61 = vmul.f32 %v382_v57, %v2756_v35  ;;  %v387_v62 = vmul.f32 %v383_v58, %v2763_v44 }
 0x228   :  { %v388_v63 = vmul.f32 %v384_v59, %v384_v59  ;;  %v389_v0 = vmul.f32 %v385_v60, %v385_v60  ;;  %v390_v1 = vmul.f32 %v386_v61, %v386_v61  ;;  %v391_v3 = vmul.f32 %v387_v62, %v387_v62 }
 0x22a   :  { %v392_v2 = vadd.f32 %v389_v0, %v388_v63 }
 0x22c   :  { %v393_v4 = vadd.f32 %v392_v2, %v390_v1 }
 0x22e   :  { %v394_v6 = vadd.f32 %v393_v4, %v391_v3 }
 0x230   :  { %v395_v7 = vrot.slane %v394_v6, 4 }
 0x232   :  { %v396_v8 = vadd.f32 %v395_v7, %v394_v6 }
 0x234   :  { %v397_v9 = vrot.slane %v396_v8, 2 }
 0x236   :  { %v398_v10 = vadd.f32 %v397_v9, %v396_v8 }
 0x238   :  { %v399_v11 = vrot.slane %v398_v10, 1 }
 0x23a   :  { %v400_v12 = vadd.f32 %v399_v11, %v398_v10 }
 0x23c   :  { %v401_v13 = vmul.f32 0.041666668, %v400_v12 }
 0x23e   :  { %v402_v14 = vadd.f32 1e-05, %v401_v13 }
 0x240   :  { %2382 = vrsqrt.f32 %v402_v14 }
 0x24a   :  { %v2383_v19 = vpop.eup %2382 }
 0x24b   :  { %v404_v20 = vmul.f32 %v2383_v19, %v165_v17 }
 0x24d   :  { %v405_v22 = vmul.f32 %v404_v20, %v379_v54  ;;  %v411_v23 = vrot.slane %v404_v20, %v2773_v18  ;;  %v2337_v54 = vld [vmem:[#allocation2 + $0x70] sm:$0xff]  }
 0x24f   :  { %v406_v24 = vsub.f32 %v166_v21, %v405_v22  ;;  %v414_v25 = vmul.f32 %v411_v23, %v334_v39  ;;  %v413_v26 = vmul.f32 %v411_v23, %v331_v36  ;;  %v415_v27 = vmul.f32 %v2129_v34, %v411_v23  ;;  %v2331_v39 = vld [vmem:[#allocation2 + $0x40] sm:$0xff]  }
 0x250   :  { %v416_v28 = vmul.f32 %v2130_v37, %v411_v23  ;;  %2159 = vmatprep.subr.bf16.mxu0 %v2331_v39 }
 0x251   :  { %v421_v29 = vrot.slane %v406_v24, %v2773_v18 }
 0x253   :  { %v424_v30 = vadd.f32 %v421_v29, %v414_v25  ;;  %v423_v31 = vadd.f32 %v421_v29, %v413_v26  ;;  %v425_v32 = vadd.f32 %v421_v29, %v415_v27  ;;  %v426_v40 = vadd.f32 %v421_v29, %v416_v28 }
 0x255   :  { %v428_v41 = vmax.f32 %v424_v30, 0.0  ;;  %v427_v42 = vmax.f32 %v423_v31, 0.0  ;;  %v429_v43 = vmax.f32 %v425_v32, 0.0  ;;  %v430_v45 = vmax.f32 %v426_v40, 0.0 }
 0x257   :  { %v431_v46 = vmul.f32 %v427_v42, %v2754_v33  ;;  %v432_v47 = vmul.f32 %v428_v41, %v2758_v38  ;;  %v433_v48 = vmul.f32 %v429_v43, %v2756_v35  ;;  %v434_v36 = vmul.f32 %v430_v45, %v2763_v44  ;;  %v167_v41 = vld [vmem:[%s3068_s11] sm:$0x1] }
 0x258   :  { %v168_v45 = vld [vmem:[%s3069_s12] sm:$0x1] }
 0x259   :  { %v435_v34 = vpack.c.bf16 %v432_v47, %v431_v46  ;;  %v436_v37 = vpack.c.bf16 %v434_v36, %v433_v48 }
 0x25b   :  { %2147 = vmatprep.mubr.bf16.mxu0 %v435_v34 }
 0x25c   :  { %2148 = vmatmul.mubr.bf16.vlgmr.msra.gmra.mrb[4].mxu0 %v436_v37 }
 0x25d   :  { %2160 = vmatpush3.bf16.msra.mxu0 %v2331_v39 }
 0x25e   :  { %2161 = vmatprep.subr.bf16.mxu0 %v2332_v49 }
 0x261   :  { %2162 = vmatpush3.bf16.msra.mxu0 %v2332_v49 }
 0x262   :  { %2163 = vmatprep.subr.bf16.mxu0 %v2333_v50 }
 0x265   :  { %2164 = vmatpush3.bf16.msra.mxu0 %v2333_v50 }
 0x266   :  { %2165 = vmatprep.subr.bf16.mxu0 %v2334_v51 }
 0x269   :  { %2166 = vmatpush3.bf16.msra.mxu0 %v2334_v51 }
 0x26a   :  { %2167 = vmatprep.subr.bf16.mxu0 %v2335_v52 }
 0x26d   :  { %2168 = vmatpush3.bf16.msra.mxu0 %v2335_v52 }
 0x26e   :  { %2169 = vmatprep.subr.bf16.mxu0 %v2336_v53 }
 0x271   :  { %2170 = vmatpush3.bf16.msra.mxu0 %v2336_v53 }
 0x272   :  { %2171 = vmatprep.subr.bf16.mxu0 %v2337_v54 }
 0x275   :  { %2172 = vmatpush3.bf16.msra.mxu0 %v2337_v54 }
 0x32f   :  { %v2149_v55 = vpop.f32.mrb[4].mxu0 }
 0x330   :  { %v519_v56 = vpop.f32.mrb[5].mxu0  ;;  %v536_v61 = vmul.f32 %v2149_v55, %v2756_v35 }
 0x331   :  { %v2150_v57 = vpop.f32.mrb[6].mxu0  ;;  %v534_v59 = vmul.f32 %v519_v56, %v2754_v33 }
 0x332   :  { %v522_v58 = vpop.f32.mrb[7].mxu0  ;;  %v537_v63 = vmul.f32 %v2150_v57, %v2763_v44 }
 0x333   :  { %v535_v60 = vmul.f32 %v522_v58, %v2758_v38 }
 0x335   :  { %v538_v62 = vadd.f32 %v535_v60, %v534_v59 }
 0x337   :  { %v539_v0 = vadd.f32 %v538_v62, %v536_v61 }
 0x339   :  { %v540_v1 = vadd.f32 %v539_v0, %v537_v63 }
 0x33b   :  { %v541_v2 = vrot.slane %v540_v1, 4 }
 0x33d   :  { %v542_v3 = vadd.f32 %v541_v2, %v540_v1  ;;  %v2541_v1 = vmov 0.0  }
 0x33f   :  { %v543_v4 = vrot.slane %v542_v3, 2 }
 0x341   :  { %v544_v6 = vadd.f32 %v543_v4, %v542_v3 }
 0x343   :  { %v545_v7 = vrot.slane %v544_v6, 1 }
 0x345   :  { %v546_v8 = vadd.f32 %v545_v7, %v544_v6 }
 0x347   :  { %v547_v9 = vmul.f32 0.041666668, %v546_v8 }
 0x349   :  { %v548_v10 = vsub.f32 %v519_v56, %v547_v9  ;;  %v549_v11 = vsub.f32 %v522_v58, %v547_v9  ;;  %v550_v12 = vsub.f32 %v2149_v55, %v547_v9  ;;  %v551_v13 = vsub.f32 %v2150_v57, %v547_v9 }
 0x34b   :  { %v552_v14 = vmul.f32 %v548_v10, %v2754_v33  ;;  %v553_v15 = vmul.f32 %v549_v11, %v2758_v38  ;;  %v554_v16 = vmul.f32 %v550_v12, %v2756_v35  ;;  %v555_v17 = vmul.f32 %v551_v13, %v2763_v44  ;;  %v2341_v10 = vld [vmem:[#allocation5 + $0x40] sm:$0xff]   ;;  %v2342_v11 = vld [vmem:[#allocation5 + $0x48] sm:$0xff]   ;;  %v2343_v12 = vld [vmem:[#allocation5 + $0x50] sm:$0xff]  }
 0x34c   :  { %v2344_v13 = vld [vmem:[#allocation5 + $0x58] sm:$0xff]  }
 0x34d   :  { %v556_v19 = vmul.f32 %v552_v14, %v552_v14  ;;  %v557_v20 = vmul.f32 %v553_v15, %v553_v15  ;;  %v558_v21 = vmul.f32 %v554_v16, %v554_v16  ;;  %v559_v23 = vmul.f32 %v555_v17, %v555_v17  ;;  %v2345_v14 = vld [vmem:[#allocation5 + $0x60] sm:$0xff]   ;;  %v2346_v15 = vld [vmem:[#allocation5 + $0x68] sm:$0xff]   ;;  %v2347_v16 = vld [vmem:[#allocation5 + $0x70] sm:$0xff]  }
 0x34e   :  { %v2348_v17 = vld [vmem:[#allocation5 + $0x78] sm:$0xff]  }
 0x34f   :  { %v560_v22 = vadd.f32 %v557_v20, %v556_v19 }
 0x351   :  { %v561_v24 = vadd.f32 %v560_v22, %v558_v21 }
 0x353   :  { %v562_v25 = vadd.f32 %v561_v24, %v559_v23 }
 0x355   :  { %v563_v26 = vrot.slane %v562_v25, 4 }
 0x357   :  { %v564_v27 = vadd.f32 %v563_v26, %v562_v25 }
 0x359   :  { %v565_v28 = vrot.slane %v564_v27, 2 }
 0x35b   :  { %v566_v29 = vadd.f32 %v565_v28, %v564_v27 }
 0x35d   :  { %v567_v30 = vrot.slane %v566_v29, 1 }
 0x35f   :  { %v568_v31 = vadd.f32 %v567_v30, %v566_v29 }
 0x361   :  { %v569_v32 = vmul.f32 0.041666668, %v568_v31 }
 0x363   :  { %v570_v40 = vadd.f32 1e-05, %v569_v32 }
 0x365   :  { %2384 = vrsqrt.f32 %v570_v40 }
 0x36f   :  { %v2385_v42 = vpop.eup %2384 }
 0x370   :  { %v572_v43 = vmul.f32 %v2385_v42, %v167_v41 }
 0x372   :  { %v573_v46 = vmul.f32 %v572_v43, %v547_v9  ;;  %v579_v47 = vrot.slane %v572_v43, %v2773_v18  ;;  %v2339_v9 = vld [vmem:[%s3061_s4] sm:$0xff]  }
 0x374   :  { %v574_v48 = vsub.f32 %v168_v45, %v573_v46  ;;  %v582_v36 = vmul.f32 %v579_v47, %v522_v58  ;;  %v581_v34 = vmul.f32 %v579_v47, %v519_v56  ;;  %v583_v37 = vmul.f32 %v2149_v55, %v579_v47  ;;  %v2338_v58 = vld [vmem:[#allocation2 + $0x78] sm:$0xff]  }
 0x375   :  { %v584_v39 = vmul.f32 %v2150_v57, %v579_v47  ;;  %2173 = vmatprep.subr.bf16.mxu0 %v2338_v58 }
 0x376   :  { %v589_v49 = vrot.slane %v574_v48, %v2773_v18  ;;  %2174 = vmatpush3.bf16.msra.mxu0 %v2338_v58 }
 0x377   :  { %2199 = vmatprep.subr.bf16.mxu0 %v2541_v1 }
 0x378   :  { %v592_v50 = vadd.f32 %v589_v49, %v582_v36  ;;  %v591_v51 = vadd.f32 %v589_v49, %v581_v34  ;;  %v593_v52 = vadd.f32 %v589_v49, %v583_v37  ;;  %v594_v53 = vadd.f32 %v589_v49, %v584_v39 }
 0x37a   :  { %v596_v54 = vmax.f32 %v592_v50, 0.0  ;;  %v595_v59 = vmax.f32 %v591_v51, 0.0  ;;  %v597_v60 = vmax.f32 %v593_v52, 0.0  ;;  %v598_v61 = vmax.f32 %v594_v53, 0.0 }
 0x37c   :  { %v599_v62 = vmul.f32 %v595_v59, %v2754_v33  ;;  %v600_v63 = vmul.f32 %v596_v54, %v2758_v38  ;;  %v601_v0 = vmul.f32 %v597_v60, %v2756_v35  ;;  %v602_v56 = vmul.f32 %v598_v61, %v2763_v44 }
 0x37e   :  { %v603_v55 = vpack.c.bf16 %v600_v63, %v599_v62  ;;  %v604_v57 = vpack.c.bf16 %v602_v56, %v601_v0 }
 0x380   :  { %2151 = vmatprep.subr.bf16.mxu1 %v603_v55 }
 0x381   :  { %2152 = vmatpush3.bf16.msra.mxu1 %v603_v55 }
 0x382   :  { %2153 = vmatprep.subr.bf16.mxu1 %v604_v57 }
 0x385   :  { %2154 = vmatpush3.bf16.msra.mxu1 %v604_v57 }
 0x386   :  { %2179 = vmatprep.subr.bf16.mxu1 %v2341_v10 }
 0x388   :  { %2156 = vmatmul.mubr.msk.bf16.vlgmr.msra.gmra.mrb[4].mxu1 %vm191_vm0, %v2731_v5  ;;  %v2816_v5 = vld [vmem:[%s3087_s24] sm:$0xff]  }
 0x389   :  { %2180 = vmatpush3.bf16.msra.mxu1 %v2341_v10  ;;  %v1949_v10 = vld [vmem:[%s3067_s10 + $0x1] sm:$0x1] }
 0x38a   :  { %2181 = vmatprep.subr.bf16.mxu1 %v2342_v11 }
 0x38d   :  { %2182 = vmatpush3.bf16.msra.mxu1 %v2342_v11 }
 0x38e   :  { %2183 = vmatprep.subr.bf16.mxu1 %v2343_v12 }
 0x391   :  { %2184 = vmatpush3.bf16.msra.mxu1 %v2343_v12 }
 0x392   :  { %2185 = vmatprep.subr.bf16.mxu1 %v2344_v13 }
 0x395   :  { %2186 = vmatpush3.bf16.msra.mxu1 %v2344_v13 }
 0x396   :  { %2187 = vmatprep.subr.bf16.mxu1 %v2345_v14 }
 0x399   :  { %2188 = vmatpush3.bf16.msra.mxu1 %v2345_v14 }
 0x39a   :  { %2189 = vmatprep.subr.bf16.mxu1 %v2346_v15 }
 0x39d   :  { %2190 = vmatpush3.bf16.msra.mxu1 %v2346_v15 }
 0x39e   :  { %2191 = vmatprep.subr.bf16.mxu1 %v2347_v16 }
 0x3a1   :  { %2192 = vmatpush3.bf16.msra.mxu1 %v2347_v16 }
 0x3a2   :  { %2193 = vmatprep.subr.bf16.mxu1 %v2348_v17 }
 0x3a5   :  { %2194 = vmatpush3.bf16.msra.mxu1 %v2348_v17 }
 0x3a6   :  { %2205 = vmatprep.subr.bf16.mxu1 %v2541_v1 }
 0x45b   :  { %v2157_v2 = vpop.f32.mrb[4].mxu1 }
 0x45c   :  { %v681_v3 = vpop.f32.mrb[5].mxu1 }
 0x45d   :  { %v2158_v4 = vpop.f32.mrb[6].mxu1 }
 0x45e   :  { %v697_v6 = vpack.c.bf16 %v2158_v4, %v2157_v2  ;;  %v684_v7 = vpop.f32.mrb[7].mxu1 }
 0x45f   :  { %v696_v8 = vpack.c.bf16 %v684_v7, %v681_v3  ;;  %v1948_v7 = vld [vmem:[%s3066_s9 + $0x1] sm:$0x1]  ;;  %s2508_s9 = scalar_lea.vmem %s1916_s29, 32 }
 0x460   :  { %p2510_p6 = scmp.lt.s32.totalorder %s2508_s9, %s2504_s25 }
 0x461   :  { %2175 = vmatprep.mubr.bf16.mxu0 %v696_v8 }
 0x462   :  { %2176 = vmatmul.mubr.bf16.vlgmr.msra.gmra.mrb[8].mxu0 %v697_v6  ;;  %p2511_p7 = por %p2510_p6, %p2509_p5 }
 0x463   :  { %2200 = vmatpush3.bf16.msra.mxu0 %v2339_v9  ;;  %2201 = vmatprep.mubr.msk.bf16.mxu0 %vm2542_vm1, %v2541_v1 }
 0x464   :  { %2225 = vmatprep.subr.bf16.mxu0 %v2541_v1  ;;  %p2512_p8 = pnand %p2511_p7, %p2505_p4 }
 0x46a   :  { %2202 = vmatmul.mubr.msk.bf16.vlgmr.msra.gmra.mrb[12].mxu0 %vm1085_vm2, %v2816_v5 }
 0x46b   :  { %2241 = vmatprep.mubr.msk.bf16.mxu0 %vm2542_vm1, %v2541_v1 }
 0x535   :  { %v2177_v19 = vpop.f32.mrb[8].mxu0 }
 0x536   :  { %v780_v20 = vpop.f32.mrb[9].mxu0  ;;  %v797_v25 = vmul.f32 %v2177_v19, %v2756_v35 }
 0x537   :  { %v2178_v21 = vpop.f32.mrb[10].mxu0  ;;  %v795_v23 = vmul.f32 %v780_v20, %v2754_v33 }
 0x538   :  { %v783_v22 = vpop.f32.mrb[11].mxu0  ;;  %v798_v27 = vmul.f32 %v2178_v21, %v2763_v44 }
 0x539   :  { %v796_v24 = vmul.f32 %v783_v22, %v2758_v38 }
 0x53b   :  { %v799_v26 = vadd.f32 %v796_v24, %v795_v23 }
 0x53d   :  { %v800_v28 = vadd.f32 %v799_v26, %v797_v25  ;;  %v2827_v29 = vpop.f32.mrb[12].mxu0 }
 0x53e   :  { %v2203_v30 = vpop.f32.mrb[13].mxu0 }
 0x53f   :  { %v801_v31 = vadd.f32 %v800_v28, %v798_v27  ;;  %v2829_v32 = vpop.f32.mrb[14].mxu0 }
 0x540   :  { %v1130_v40 = vpack.c.bf16 %v2829_v32, %v2827_v29  ;;  %v2204_v41 = vpop.f32.mrb[15].mxu0  ;;  %v2361_v29 = vld [vmem:[#allocation8 + $0x20] sm:$0xff]   ;;  %v2362_v32 = vld [vmem:[#allocation8 + $0x28] sm:$0xff]  }
 0x541   :  { %v802_v42 = vrot.slane %v801_v31, 4 }
 0x543   :  { %v803_v43 = vadd.f32 %v802_v42, %v801_v31 }
 0x545   :  { %v804_v45 = vrot.slane %v803_v43, 2 }
 0x547   :  { %v805_v46 = vadd.f32 %v804_v45, %v803_v43 }
 0x549   :  { %v806_v47 = vrot.slane %v805_v46, 1 }
 0x54b   :  { %v807_v48 = vadd.f32 %v806_v47, %v805_v46  ;;  %v2350_v46 = vld [vmem:[#allocation7 + $0x8] sm:$0xff]   ;;  %v2351_v47 = vld [vmem:[#allocation7 + $0x10] sm:$0xff]  }
 0x54d   :  { %v808_v36 = vmul.f32 0.041666668, %v807_v48  ;;  %v2352_v48 = vld [vmem:[#allocation7 + $0x18] sm:$0xff]  }
 0x54f   :  { %v809_v34 = vsub.f32 %v780_v20, %v808_v36  ;;  %v810_v37 = vsub.f32 %v783_v22, %v808_v36  ;;  %v811_v39 = vsub.f32 %v2177_v19, %v808_v36  ;;  %v812_v49 = vsub.f32 %v2178_v21, %v808_v36 }
 0x551   :  { %v813_v50 = vmul.f32 %v809_v34, %v2754_v33  ;;  %v814_v51 = vmul.f32 %v810_v37, %v2758_v38  ;;  %v815_v52 = vmul.f32 %v811_v39, %v2756_v35  ;;  %v816_v53 = vmul.f32 %v812_v49, %v2763_v44  ;;  %v2354_v34 = vld [vmem:[#allocation7 + $0x28] sm:$0xff]   ;;  %v2355_v37 = vld [vmem:[#allocation7 + $0x30] sm:$0xff]   ;;  %v2356_v39 = vld [vmem:[#allocation7 + $0x38] sm:$0xff]  }
 0x552   :  { %v2357_v49 = vld [vmem:[#allocation8] sm:$0xff]  }
 0x553   :  { %v817_v54 = vmul.f32 %v813_v50, %v813_v50  ;;  %v818_v59 = vmul.f32 %v814_v51, %v814_v51  ;;  %v819_v60 = vmul.f32 %v815_v52, %v815_v52  ;;  %v820_v62 = vmul.f32 %v816_v53, %v816_v53  ;;  %2226 = vmatpush3.bf16.msra.mxu0 %v2357_v49  ;;  %v2358_v50 = vld [vmem:[#allocation8 + $0x8] sm:$0xff]   ;;  %v2359_v51 = vld [vmem:[#allocation8 + $0x10] sm:$0xff]   ;;  %v2360_v52 = vld [vmem:[#allocation8 + $0x18] sm:$0xff]  }
 0x554   :  { %2227 = vmatprep.subr.bf16.mxu0 %v2541_v1  ;;  %v2364_v53 = vld [vmem:[#allocation8 + $0x38] sm:$0xff]  }
 0x555   :  { %v821_v61 = vadd.f32 %v818_v59, %v817_v54 }
 0x557   :  { %v822_v63 = vadd.f32 %v821_v61, %v819_v60  ;;  %2228 = vmatpush3.bf16.msra.mxu0 %v2358_v50 }
 0x558   :  { %2229 = vmatprep.subr.bf16.mxu0 %v2541_v1 }
 0x559   :  { %v823_v0 = vadd.f32 %v822_v63, %v820_v62 }
 0x55b   :  { %v824_v56 = vrot.slane %v823_v0, 4  ;;  %2230 = vmatpush3.bf16.msra.mxu0 %v2359_v51 }
 0x55c   :  { %2231 = vmatprep.subr.bf16.mxu0 %v2541_v1 }
 0x55d   :  { %v825_v55 = vadd.f32 %v824_v56, %v823_v0 }
 0x55f   :  { %v826_v57 = vrot.slane %v825_v55, 2  ;;  %2232 = vmatpush3.bf16.msra.mxu0 %v2360_v52 }
 0x560   :  { %2233 = vmatprep.subr.bf16.mxu0 %v2541_v1 }
 0x561   :  { %v827_v58 = vadd.f32 %v826_v57, %v825_v55 }
 0x563   :  { %v828_v2 = vrot.slane %v827_v58, 1  ;;  %2234 = vmatpush3.bf16.msra.mxu0 %v2361_v29 }
 0x564   :  { %2235 = vmatprep.subr.bf16.mxu0 %v2541_v1 }
 0x565   :  { %v829_v3 = vadd.f32 %v828_v2, %v827_v58 }
 0x567   :  { %v830_v4 = vmul.f32 0.041666668, %v829_v3  ;;  %2236 = vmatpush3.bf16.msra.mxu0 %v2362_v32 }
 0x568   :  { %2237 = vmatprep.subr.bf16.mxu0 %v2541_v1 }
 0x569   :  { %v831_v6 = vadd.f32 1e-05, %v830_v4 }
 0x56b   :  { %2386 = vrsqrt.f32 %v831_v6 }
 0x575   :  { %v2387_v8 = vpop.eup %2386 }
 0x576   :  { %v833_v9 = vmul.f32 %v2387_v8, %v1948_v7 }
 0x578   :  { %v834_v11 = vmul.f32 %v833_v9, %v808_v36  ;;  %v840_v12 = vrot.slane %v833_v9, %v2773_v18  ;;  %v2353_v36 = vld [vmem:[#allocation7 + $0x20] sm:$0xff]  }
 0x57a   :  { %v835_v13 = vsub.f32 %v1949_v10, %v834_v11  ;;  %v843_v14 = vmul.f32 %v840_v12, %v783_v22  ;;  %v842_v15 = vmul.f32 %v840_v12, %v780_v20  ;;  %v844_v16 = vmul.f32 %v2177_v19, %v840_v12  ;;  %v2349_v22 = vld [vmem:[#allocation7] sm:$0xff]  }
 0x57b   :  { %v845_v17 = vmul.f32 %v2178_v21, %v840_v12 }
 0x57c   :  { %v850_v23 = vrot.slane %v835_v13, %v2773_v18 }
 0x57e   :  { %v853_v24 = vadd.f32 %v850_v23, %v843_v14  ;;  %v852_v25 = vadd.f32 %v850_v23, %v842_v15  ;;  %v854_v26 = vadd.f32 %v850_v23, %v844_v16  ;;  %v855_v27 = vadd.f32 %v850_v23, %v845_v17 }
 0x580   :  { %v857_v28 = vmax.f32 %v853_v24, 0.0  ;;  %v856_v30 = vmax.f32 %v852_v25, 0.0  ;;  %v858_v31 = vmax.f32 %v854_v26, 0.0  ;;  %v859_v41 = vmax.f32 %v855_v27, 0.0 }
 0x582   :  { %v860_v42 = vmul.f32 %v856_v30, %v2754_v33  ;;  %v861_v43 = vmul.f32 %v857_v28, %v2758_v38  ;;  %v862_v45 = vmul.f32 %v858_v31, %v2756_v35  ;;  %v863_v20 = vmul.f32 %v859_v41, %v2763_v44  ;;  %v2898_v28 = vpop.permute.xlu0 %1222  ;;  %v2900_v31 = vpop.permute.xlu1 %1227 }
 0x584   :  { %v864_v19 = vpack.c.bf16 %v861_v43, %v860_v42  ;;  %v865_v21 = vpack.c.bf16 %v863_v20, %v862_v45 }
 0x586   :  { %2195 = vmatprep.mubr.bf16.mxu1 %v864_v19 }
 0x587   :  { %2196 = vmatmul.mubr.bf16.vlgmr.msra.gmra.mrb[8].mxu1 %v865_v21 }
 0x588   :  { %2206 = vmatpush3.bf16.msra.mxu1 %v2349_v22  ;;  %2221 = vmatprep.mubr.msk.bf16.mxu1 %vm2542_vm1, %v2541_v1 }
 0x589   :  { %2207 = vmatprep.subr.bf16.mxu1 %v2541_v1 }
 0x58c   :  { %2208 = vmatpush3.bf16.msra.mxu1 %v2350_v46 }
 0x58d   :  { %2209 = vmatprep.subr.bf16.mxu1 %v2541_v1 }
 0x590   :  { %2210 = vmatpush3.bf16.msra.mxu1 %v2351_v47 }
 0x591   :  { %2211 = vmatprep.subr.bf16.mxu1 %v2541_v1 }
 0x594   :  { %2212 = vmatpush3.bf16.msra.mxu1 %v2352_v48 }
 0x595   :  { %2213 = vmatprep.subr.bf16.mxu1 %v2541_v1 }
 0x598   :  { %2214 = vmatpush3.bf16.msra.mxu1 %v2353_v36 }
 0x599   :  { %2215 = vmatprep.subr.bf16.mxu1 %v2541_v1 }
 0x59c   :  { %2216 = vmatpush3.bf16.msra.mxu1 %v2354_v34 }
 0x59d   :  { %2217 = vmatprep.subr.bf16.mxu1 %v2541_v1 }
 0x5a0   :  { %2218 = vmatpush3.bf16.msra.mxu1 %v2355_v37 }
 0x5a1   :  { %2219 = vmatprep.subr.bf16.mxu1 %v2541_v1 }
 0x5a4   :  { %2220 = vmatpush3.bf16.msra.mxu1 %v2356_v39 }
 0x5a5   :  { %2245 = vmatprep.subr.bf16.mxu1 %v2541_v1 }
 0x5a7   :  { %2222 = vmatmul.mubr.bf16.vlgmr.msra.gmra.mrb[12].mxu1 %v1130_v40  ;;  %v2363_v40 = vld [vmem:[#allocation8 + $0x30] sm:$0xff]  }
 0x5a8   :  { %2247 = vmatprep.mubr.msk.bf16.mxu1 %vm2542_vm1, %v2541_v1  ;;  %2238 = vmatpush3.bf16.msra.mxu0 %v2363_v40 }
 0x5a9   :  { %2239 = vmatprep.subr.bf16.mxu0 %v2541_v1 }
 0x5ac   :  { %2240 = vmatpush3.bf16.msra.mxu0 %v2364_v53 }
 0x5ad   :  { %2251 = vmatprep.subr.bf16.mxu0 %v2541_v1 }
 0x65a   :  { %v2872_v54 = vpop.f32.mrb[8].mxu1 }
 0x65b   :  { %v2874_v59 = vpop.f32.mrb[9].mxu1  ;;  %v965_v0 = vmul.f32 %v2872_v54, %v2756_v35 }
 0x65c   :  { %v2876_v60 = vpop.f32.mrb[10].mxu1  ;;  %v963_v62 = vmul.f32 %v2874_v59, %v2754_v33 }
 0x65d   :  { %v2878_v61 = vpop.f32.mrb[11].mxu1  ;;  %v966_v55 = vmul.f32 %v2876_v60, %v2763_v44 }
 0x65e   :  { %v964_v63 = vmul.f32 %v2878_v61, %v2758_v38 }
 0x660   :  { %v967_v56 = vadd.f32 %v964_v63, %v963_v62 }
 0x662   :  { %v968_v57 = vadd.f32 %v967_v56, %v965_v0 }
 0x664   :  { %v969_v58 = vadd.f32 %v968_v57, %v966_v55 }
 0x666   :  { %v970_v2 = vrot.slane %v969_v58, 4 }
 0x668   :  { %v971_v3 = vadd.f32 %v970_v2, %v969_v58 }
 0x66a   :  { %v972_v4 = vrot.slane %v971_v3, 2 }
 0x66c   :  { %v973_v6 = vadd.f32 %v972_v4, %v971_v3  ;;  %v1950_v3 = vld [vmem:[%s3068_s11 + $0x1] sm:$0x1] }
 0x66e   :  { %v974_v7 = vrot.slane %v973_v6, 1 }
 0x670   :  { %v975_v8 = vadd.f32 %v974_v7, %v973_v6 }
 0x672   :  { %v976_v9 = vmul.f32 0.041666668, %v975_v8 }
 0x674   :  { %v977_v10 = vsub.f32 %v2874_v59, %v976_v9  ;;  %v978_v11 = vsub.f32 %v2878_v61, %v976_v9  ;;  %v979_v12 = vsub.f32 %v2872_v54, %v976_v9  ;;  %v980_v13 = vsub.f32 %v2876_v60, %v976_v9 }
 0x676   :  { %v981_v14 = vmul.f32 %v977_v10, %v2754_v33  ;;  %v982_v15 = vmul.f32 %v978_v11, %v2758_v38  ;;  %v983_v16 = vmul.f32 %v979_v12, %v2756_v35  ;;  %v984_v17 = vmul.f32 %v980_v13, %v2763_v44  ;;  %v1951_v10 = vld [vmem:[%s3069_s12 + $0x1] sm:$0x1] }
 0x678   :  { %v985_v23 = vmul.f32 %v981_v14, %v981_v14  ;;  %v986_v24 = vmul.f32 %v982_v15, %v982_v15  ;;  %v987_v25 = vmul.f32 %v983_v16, %v983_v16  ;;  %v988_v41 = vmul.f32 %v984_v17, %v984_v17 }
 0x67a   :  { %v989_v26 = vadd.f32 %v986_v24, %v985_v23  ;;  %v2896_v27 = vpop.f32.mrb[12].mxu1 }
 0x67b   :  { %v2223_v30 = vpop.f32.mrb[13].mxu1  ;;  %v1230_v45 = vmul.f32 %v2898_v28, %v2896_v27 }
 0x67c   :  { %v990_v42 = vadd.f32 %v989_v26, %v987_v25  ;;  %v2902_v43 = vpop.f32.mrb[14].mxu1 }
 0x67d   :  { %v1231_v20 = vmul.f32 %v2900_v31, %v2902_v43  ;;  %v2224_v19 = vpop.f32.mrb[15].mxu1 }
 0x67e   :  { %v991_v21 = vadd.f32 %v990_v42, %v988_v41 }
 0x67f   :  { %v1232_v22 = vadd.f32 %v1231_v20, %v1230_v45 }
 0x680   :  { %v992_v46 = vrot.slane %v991_v21, 4 }
 0x681   :  { %v1233_v47 = vrot.slane %v1232_v22, 4 }
 0x682   :  { %v993_v48 = vadd.f32 %v992_v46, %v991_v21 }
 0x683   :  { %v1234_v36 = vadd.f32 %v1233_v47, %v1232_v22 }
 0x684   :  { %v994_v34 = vrot.slane %v993_v48, 2 }
 0x685   :  { %v1235_v37 = vrot.slane %v1234_v36, 2 }
 0x686   :  { %v995_v39 = vadd.f32 %v994_v34, %v993_v48 }
 0x687   :  { %v1236_v49 = vadd.f32 %v1235_v37, %v1234_v36 }
 0x688   :  { %v996_v50 = vrot.slane %v995_v39, 1 }
 0x689   :  { %v1237_v51 = vrot.slane %v1236_v49, 1 }
 0x68a   :  { %v997_v52 = vadd.f32 %v996_v50, %v995_v39 }
 0x68b   :  { %v1238_v29 = vadd.f32 %v1237_v51, %v1236_v49 }
 0x68c   :  { %v998_v32 = vmul.f32 0.041666668, %v997_v52 }
 0x68d   :  { %v1239_v40 = vmul.f32 0.5, %v1238_v29 }
 0x68e   :  { %v999_v53 = vadd.f32 1e-05, %v998_v32 }
 0x68f   :  { %v1240_v62 = vsub.f32 %v2896_v27, %v1239_v40  ;;  %v1241_v63 = vsub.f32 %v2902_v43, %v1239_v40 }
 0x690   :  { %2388 = vrsqrt.f32 %v999_v53 }
 0x691   :  { %v1242_v0 = vmul.f32 %v1240_v62, %v2898_v28  ;;  %v1243_v56 = vmul.f32 %v1241_v63, %v2900_v31 }
 0x693   :  { %v1244_v55 = vmul.f32 %v1242_v0, %v1242_v0  ;;  %v1245_v57 = vmul.f32 %v1243_v56, %v1243_v56  ;;  %v2368_v0 = vld [vmem:[#allocation7 + $0x58] sm:$0xff]   ;;  %v2369_v56 = vld [vmem:[#allocation7 + $0x60] sm:$0xff]  }
 0x695   :  { %v1246_v58 = vadd.f32 %v1245_v57, %v1244_v55  ;;  %v2370_v55 = vld [vmem:[#allocation7 + $0x68] sm:$0xff]   ;;  %v2371_v57 = vld [vmem:[#allocation7 + $0x70] sm:$0xff]  }
 0x697   :  { %v1247_v2 = vrot.slane %v1246_v58, 4 }
 0x699   :  { %v1248_v4 = vadd.f32 %v1247_v2, %v1246_v58 }
 0x69a   :  { %v2389_v6 = vpop.eup %2388 }
 0x69b   :  { %v1001_v7 = vmul.f32 %v2389_v6, %v1950_v3  ;;  %v1249_v8 = vrot.slane %v1248_v4, 2 }
 0x69d   :  { %v1002_v11 = vmul.f32 %v1001_v7, %v976_v9  ;;  %v1008_v12 = vrot.slane %v1001_v7, %v2773_v18  ;;  %v1250_v13 = vadd.f32 %v1249_v8, %v1248_v4 }
 0x69f   :  { %v1003_v14 = vsub.f32 %v1951_v10, %v1002_v11  ;;  %v1011_v15 = vmul.f32 %v1008_v12, %v2878_v61  ;;  %v1251_v16 = vrot.slane %v1250_v13, 1  ;;  %v1010_v17 = vmul.f32 %v1008_v12, %v2874_v59 }
 0x6a0   :  { %v1012_v23 = vmul.f32 %v2872_v54, %v1008_v12  ;;  %v1013_v24 = vmul.f32 %v2876_v60, %v1008_v12 }
 0x6a1   :  { %v1018_v25 = vrot.slane %v1003_v14, %v2773_v18  ;;  %v1252_v26 = vadd.f32 %v1251_v16, %v1250_v13 }
 0x6a3   :  { %v1021_v30 = vadd.f32 %v1018_v25, %v1011_v15  ;;  %v1253_v41 = vmul.f32 0.5, %v1252_v26  ;;  %v1020_v42 = vadd.f32 %v1018_v25, %v1010_v17  ;;  %v1022_v9 = vadd.f32 %v1018_v25, %v1012_v23 }
 0x6a4   :  { %v1023_v45 = vadd.f32 %v1018_v25, %v1013_v24 }
 0x6a5   :  { %v1025_v20 = vmax.f32 %v1021_v30, 0.0  ;;  %v1254_v19 = vadd.f32 1e-05, %v1253_v41  ;;  %v1024_v21 = vmax.f32 %v1020_v42, 0.0  ;;  %v1026_v22 = vmax.f32 %v1022_v9, 0.0 }
 0x6a6   :  { %v1027_v61 = vmax.f32 %v1023_v45, 0.0 }
 0x6a7   :  { %v2925_v46 = vmul.f32 %v1025_v20, %v2758_v38  ;;  %2390 = vrsqrt.f32 %v1254_v19  ;;  %v2928_v54 = vmul.f32 %v1024_v21, %v2754_v33  ;;  %v2931_v59 = vmul.f32 %v1026_v22, %v2756_v35  ;;  %v1070_v38 = vld [vmem:[%s3072_s15] sm:$0x1] }
 0x6a8   :  { %v2934_v60 = vmul.f32 %v1027_v61, %v2763_v44  ;;  %v1071_v33 = vld [vmem:[%s3073_s16] sm:$0x1] }
 0x6a9   :  { %v1032_v47 = vpack.c.bf16 %v2925_v46, %v2928_v54  ;;  %v2375_v46 = vld [vmem:[#allocation8 + $0x48] sm:$0xff]   ;;  %v2376_v54 = vld [vmem:[#allocation8 + $0x50] sm:$0xff]  }
 0x6aa   :  { %v1033_v48 = vpack.c.bf16 %v2934_v60, %v2931_v59  ;;  %v2378_v59 = vld [vmem:[#allocation8 + $0x60] sm:$0xff]   ;;  %v2379_v60 = vld [vmem:[#allocation8 + $0x68] sm:$0xff]  }
 0x6b1   :  { %v2391_v36 = vpop.eup %2390 }
 0x6b2   :  { %v1256_v34 = vmul.f32 %v2391_v36, %v1070_v38  ;;  %v1072_v38 = vld [vmem:[%s3074_s17] sm:$0x1] }
 0x6b4   :  { %v1257_v35 = vmul.f32 %v1256_v34, %v1239_v40  ;;  %v1263_v44 = vrot.slane %v1256_v34, %v2773_v18  ;;  %v2365_v40 = vld [vmem:[#allocation7 + $0x40] sm:$0xff]  }
 0x6b6   :  { %v1258_v37 = vsub.f32 %v1071_v33, %v1257_v35  ;;  %v1265_v39 = vmul.f32 %v1263_v44, %v2896_v27  ;;  %v1266_v49 = vmul.f32 %v1263_v44, %v2902_v43  ;;  %v2366_v27 = vld [vmem:[#allocation7 + $0x48] sm:$0xff]   ;;  %v2367_v43 = vld [vmem:[#allocation7 + $0x50] sm:$0xff]   ;;  %v1073_v33 = vld [vmem:[%s3075_s18] sm:$0x1] }
 0x6b8   :  { %v1271_v50 = vrot.slane %v1258_v37, %v2773_v18 }
 0x6ba   :  { %v1273_v51 = vadd.f32 %v1271_v50, %v1265_v39  ;;  %v1274_v52 = vadd.f32 %v1271_v50, %v1266_v49 }
 0x6bc   :  { %v1275_v29 = vmax.f32 %v1273_v51, 0.0  ;;  %v1276_v32 = vmax.f32 %v1274_v52, 0.0 }
 0x6be   :  { %v1278_v53 = vmul.f32 %v1276_v32, %v2900_v31  ;;  %v1277_v62 = vmul.f32 %v1275_v29, %v2898_v28 }
 0x6c0   :  { %v1279_v63 = vpack.c.bf16 %v1278_v53, %v1277_v62 }
 0x6c2   :  { %2242 = vmatmul.mubr.bf16.vlgmr.msra.gmra.mrb[16].mxu0 %v1279_v63 }
 0x6c3   :  { %2267 = vmatprep.mubr.msk.bf16.mxu0 %vm2542_vm1, %v2541_v1  ;;  %2252 = vmatpush3.bf16.msra.mxu0 %v2365_v40  ;;  %v2372_v40 = vld [vmem:[#allocation7 + $0x78] sm:$0xff]  }
 0x6c4   :  { %2253 = vmatprep.subr.bf16.mxu0 %v2541_v1 }
 0x6c7   :  { %2254 = vmatpush3.bf16.msra.mxu0 %v2366_v27 }
 0x6c8   :  { %2255 = vmatprep.subr.bf16.mxu0 %v2541_v1 }
 0x6cb   :  { %2256 = vmatpush3.bf16.msra.mxu0 %v2367_v43 }
 0x6cc   :  { %2257 = vmatprep.subr.bf16.mxu0 %v2541_v1 }
 0x6cf   :  { %2258 = vmatpush3.bf16.msra.mxu0 %v2368_v0 }
 0x6d0   :  { %2259 = vmatprep.subr.bf16.mxu0 %v2541_v1 }
 0x6d3   :  { %2260 = vmatpush3.bf16.msra.mxu0 %v2369_v56 }
 0x6d4   :  { %2261 = vmatprep.subr.bf16.mxu0 %v2541_v1 }
 0x6d7   :  { %2262 = vmatpush3.bf16.msra.mxu0 %v2370_v55 }
 0x6d8   :  { %2263 = vmatprep.subr.bf16.mxu0 %v2541_v1 }
 0x6db   :  { %2264 = vmatpush3.bf16.msra.mxu0 %v2371_v57  ;;  %v2374_v57 = vld [vmem:[#allocation8 + $0x40] sm:$0xff]  }
 0x6dc   :  { %2265 = vmatprep.subr.bf16.mxu0 %v2541_v1 }
 0x6df   :  { %2266 = vmatpush3.bf16.msra.mxu0 %v2372_v40 }
 0x6e0   :  { %2291 = vmatprep.subr.bf16.mxu0 %v2541_v1 }
 0x795   :  { %v1362_v58 = vpop.f32.mrb[16].mxu0 }
 0x796   :  { %v2243_v2 = vpop.f32.mrb[17].mxu0  ;;  %v1369_v4 = vmul.f32 %v1362_v58, %v2898_v28 }
 0x797   :  { %v1365_v3 = vpop.f32.mrb[18].mxu0 }
 0x798   :  { %v1370_v6 = vmul.f32 %v1365_v3, %v2900_v31  ;;  %v2244_v7 = vpop.f32.mrb[19].mxu0 }
 0x79a   :  { %v1371_v8 = vadd.f32 %v1370_v6, %v1369_v4 }
 0x79c   :  { %v1372_v10 = vrot.slane %v1371_v8, 4 }
 0x79e   :  { %v1373_v11 = vadd.f32 %v1372_v10, %v1371_v8 }
 0x7a0   :  { %v1374_v12 = vrot.slane %v1373_v11, 2 }
 0x7a2   :  { %v1375_v13 = vadd.f32 %v1374_v12, %v1373_v11 }
 0x7a4   :  { %v1376_v14 = vrot.slane %v1375_v13, 1 }
 0x7a6   :  { %v1377_v15 = vadd.f32 %v1376_v14, %v1375_v13 }
 0x7a8   :  { %v1378_v16 = vmul.f32 0.5, %v1377_v15 }
 0x7aa   :  { %v1379_v17 = vsub.f32 %v1362_v58, %v1378_v16  ;;  %v1380_v23 = vsub.f32 %v1365_v3, %v1378_v16 }
 0x7ac   :  { %v1381_v24 = vmul.f32 %v1379_v17, %v2898_v28  ;;  %v1382_v25 = vmul.f32 %v1380_v23, %v2900_v31 }
 0x7ae   :  { %v1383_v26 = vmul.f32 %v1381_v24, %v1381_v24  ;;  %v1384_v30 = vmul.f32 %v1382_v25, %v1382_v25 }
 0x7b0   :  { %v1385_v41 = vadd.f32 %v1384_v30, %v1383_v26 }
 0x7b2   :  { %v1386_v42 = vrot.slane %v1385_v41, 4 }
 0x7b4   :  { %v1387_v9 = vadd.f32 %v1386_v42, %v1385_v41 }
 0x7b6   :  { %v1388_v45 = vrot.slane %v1387_v9, 2 }
 0x7b8   :  { %v1389_v20 = vadd.f32 %v1388_v45, %v1387_v9 }
 0x7ba   :  { %v1390_v19 = vrot.slane %v1389_v20, 1 }
 0x7bc   :  { %v1391_v21 = vadd.f32 %v1390_v19, %v1389_v20 }
 0x7be   :  { %v1392_v22 = vmul.f32 0.5, %v1391_v21 }
 0x7c0   :  { %v1393_v61 = vadd.f32 1e-05, %v1392_v22 }
 0x7c2   :  { %2392 = vrsqrt.f32 %v1393_v61 }
 0x7cc   :  { %v2393_v36 = vpop.eup %2392 }
 0x7cd   :  { %v1395_v34 = vmul.f32 %v2393_v36, %v1072_v38 }
 0x7cf   :  { %v1396_v35 = vmul.f32 %v1395_v34, %v1378_v16  ;;  %v1402_v44 = vrot.slane %v1395_v34, %v2773_v18 }
 0x7d1   :  { %v1397_v37 = vsub.f32 %v1073_v33, %v1396_v35  ;;  %v1404_v39 = vmul.f32 %v1402_v44, %v1362_v58  ;;  %v1405_v49 = vmul.f32 %v1402_v44, %v1365_v3  ;;  %v2381_v58 = vld [vmem:[#allocation8 + $0x78] sm:$0xff]  }
 0x7d3   :  { %v1410_v50 = vrot.slane %v1397_v37, %v2773_v18  ;;  %v1989_v37 = vld [vmem:[%s3072_s15 + $0x1] sm:$0x1] }
 0x7d5   :  { %v1412_v51 = vadd.f32 %v1410_v50, %v1404_v39  ;;  %v1413_v52 = vadd.f32 %v1410_v50, %v1405_v49  ;;  %v1990_v50 = vld [vmem:[%s3073_s16 + $0x1] sm:$0x1] }
 0x7d7   :  { %v1414_v29 = vmax.f32 %v1412_v51, 0.0  ;;  %v1415_v32 = vmax.f32 %v1413_v52, 0.0 }
 0x7d9   :  { %v1417_v53 = vmul.f32 %v1415_v32, %v2900_v31  ;;  %v1416_v62 = vmul.f32 %v1414_v29, %v2898_v28 }
 0x7db   :  { %v1418_v63 = vpack.c.bf16 %v1417_v53, %v1416_v62 }
 0x7dd   :  { %2246 = vmatpush3.bf16.msra.mxu1 %v1418_v63 }
 0x7de   :  { %2271 = vmatprep.subr.bf16.mxu1 %v2541_v1 }
 0x7e0   :  { %2248 = vmatmul.mubr.msk.bf16.vlgmr.msra.gmra.mrb[16].mxu1 %vm1085_vm2, %v2816_v5  ;;  %v2373_v5 = vld [vmem:[%s3063_s6] sm:$0xff]  }
 0x7e1   :  { %2287 = vmatprep.mubr.msk.bf16.mxu1 %vm2542_vm1, %v2541_v1  ;;  %2272 = vmatpush3.bf16.msra.mxu1 %v2374_v57 }
 0x7e2   :  { %2273 = vmatprep.subr.bf16.mxu1 %v2541_v1 }
 0x7e5   :  { %2274 = vmatpush3.bf16.msra.mxu1 %v2375_v46 }
 0x7e6   :  { %2275 = vmatprep.subr.bf16.mxu1 %v2541_v1 }
 0x7e9   :  { %2276 = vmatpush3.bf16.msra.mxu1 %v2376_v54 }
 0x7ea   :  { %2277 = vmatprep.subr.bf16.mxu1 %v2541_v1 }
 0x8b3   :  { %v1495_v27 = vpop.f32.mrb[16].mxu1 }
 0x8b4   :  { %v2249_v43 = vpop.f32.mrb[17].mxu1 }
 0x8b5   :  { %v1498_v0 = vpop.f32.mrb[18].mxu1 }
 0x8b6   :  { %v1502_v56 = vpack.c.bf16 %v1498_v0, %v1495_v27  ;;  %v2250_v55 = vpop.f32.mrb[19].mxu1 }
 0x8b8   :  { %2268 = vmatmul.mubr.bf16.vlgmr.msra.gmra.mrb[20].mxu0 %v1502_v56 }
 0x8b9   :  { %2292 = vmatpush3.bf16.msra.mxu0 %v1032_v47  ;;  %2295 = vmatprep.mubr.msk.bf16.mxu0 %vm2542_vm1, %v2541_v1  ;;  %v2377_v47 = vld [vmem:[#allocation8 + $0x58] sm:$0xff]  }
 0x8ba   :  { %2293 = vmatprep.subr.bf16.mxu0 %v2541_v1  ;;  %2278 = vmatpush3.bf16.msra.mxu1 %v2377_v47 }
 0x8bb   :  { %2279 = vmatprep.subr.bf16.mxu1 %v2541_v1 }
 0x8bd   :  { %2294 = vmatpush3.bf16.msra.mxu0 %v1033_v48  ;;  %v2380_v48 = vld [vmem:[#allocation8 + $0x70] sm:$0xff]  }
 0x8be   :  { %2280 = vmatpush3.bf16.msra.mxu1 %v2378_v59 }
 0x8bf   :  { %2281 = vmatprep.subr.bf16.mxu1 %v2541_v1 }
 0x8c0   :  { %2296 = vmatmul.mubr.msk.bf16.vlgmr.msra.gmra.mrb[24].mxu0 %vm191_vm0, %v2373_v5 }
 0x8c2   :  { %2282 = vmatpush3.bf16.msra.mxu1 %v2379_v60 }
 0x8c3   :  { %2283 = vmatprep.subr.bf16.mxu1 %v2541_v1 }
 0x8c6   :  { %2284 = vmatpush3.bf16.msra.mxu1 %v2380_v48 }
 0x8c7   :  { %2285 = vmatprep.subr.bf16.mxu1 %v2541_v1 }
 0x8ca   :  { %2286 = vmatpush3.bf16.msra.mxu1 %v2381_v58 }
 0x98b   :  { %v1585_v2 = vpop.f32.mrb[20].mxu0 }
 0x98c   :  { %v2269_v3 = vpop.f32.mrb[21].mxu0  ;;  %v1592_v6 = vmul.f32 %v1585_v2, %v2898_v28 }
 0x98d   :  { %v1588_v4 = vpop.f32.mrb[22].mxu0 }
 0x98e   :  { %v1593_v7 = vmul.f32 %v1588_v4, %v2900_v31  ;;  %v2270_v8 = vpop.f32.mrb[23].mxu0 }
 0x990   :  { %v1594_v10 = vadd.f32 %v1593_v7, %v1592_v6 }
 0x992   :  { %v1595_v11 = vrot.slane %v1594_v10, 4 }
 0x993   :  { %v3003_v12 = vpop.f32.mrb[24].mxu0 }
 0x994   :  { %v1596_v13 = vadd.f32 %v1595_v11, %v1594_v10  ;;  %v2297_v14 = vpop.f32.mrb[25].mxu0  ;;  %v1834_v15 = vmul.f32 %v3003_v12, %v3003_v12 }
 0x995   :  { %v3007_v1 = vpop.f32.mrb[26].mxu0 }
 0x996   :  { %v1597_v16 = vrot.slane %v1596_v13, 2  ;;  %1836 = vadd.xlane.f32.xlu0 %v1834_v15  ;;  %v1835_v17 = vmul.f32 %v3007_v1, %v3007_v1  ;;  %v2298_v23 = vpop.f32.mrb[27].mxu0 }
 0x998   :  { %v1598_v24 = vadd.f32 %v1597_v16, %v1596_v13  ;;  %1838 = vadd.xlane.f32.xlu1 %v1835_v17 }
 0x99a   :  { %v1599_v25 = vrot.slane %v1598_v24, 1 }
 0x99c   :  { %v1600_v26 = vadd.f32 %v1599_v25, %v1598_v24 }
 0x99e   :  { %v1601_v30 = vmul.f32 0.5, %v1600_v26 }
 0x9a0   :  { %v1602_v41 = vsub.f32 %v1585_v2, %v1601_v30  ;;  %v1603_v42 = vsub.f32 %v1588_v4, %v1601_v30 }
 0x9a2   :  { %v1604_v9 = vmul.f32 %v1602_v41, %v2898_v28  ;;  %v1605_v45 = vmul.f32 %v1603_v42, %v2900_v31 }
 0x9a4   :  { %v1606_v20 = vmul.f32 %v1604_v9, %v1604_v9  ;;  %v1607_v19 = vmul.f32 %v1605_v45, %v1605_v45  ;;  %v1991_v9 = vld [vmem:[%s3074_s17 + $0x1] sm:$0x1] }
 0x9a6   :  { %v1608_v21 = vadd.f32 %v1607_v19, %v1606_v20  ;;  %v1992_v19 = vld [vmem:[%s3075_s18 + $0x1] sm:$0x1] }
 0x9a8   :  { %v1609_v22 = vrot.slane %v1608_v21, 4 }
 0x9aa   :  { %v1610_v61 = vadd.f32 %v1609_v22, %v1608_v21 }
 0x9ac   :  { %v1611_v38 = vrot.slane %v1610_v61, 2 }
 0x9ae   :  { %v1612_v36 = vadd.f32 %v1611_v38, %v1610_v61 }
 0x9b0   :  { %v1613_v34 = vrot.slane %v1612_v36, 1 }
 0x9b2   :  { %v1614_v33 = vadd.f32 %v1613_v34, %v1612_v36 }
 0x9b4   :  { %v1615_v35 = vmul.f32 0.5, %v1614_v33 }
 0x9b6   :  { %v1616_v44 = vadd.f32 1e-05, %v1615_v35 }
 0x9b8   :  { %2394 = vrsqrt.f32 %v1616_v44 }
 0x9c2   :  { %v2395_v39 = vpop.eup %2394 }
 0x9c3   :  { %v1618_v49 = vmul.f32 %v2395_v39, %v1989_v37 }
 0x9c5   :  { %v1619_v51 = vmul.f32 %v1618_v49, %v1601_v30  ;;  %v1625_v52 = vrot.slane %v1618_v49, %v2773_v18 }
 0x9c7   :  { %v1620_v29 = vsub.f32 %v1990_v50, %v1619_v51  ;;  %v1627_v32 = vmul.f32 %v1625_v52, %v1585_v2  ;;  %v1628_v53 = vmul.f32 %v1625_v52, %v1588_v4 }
 0x9c9   :  { %v1633_v62 = vrot.slane %v1620_v29, %v2773_v18 }
 0x9cb   :  { %v1635_v63 = vadd.f32 %v1633_v62, %v1627_v32  ;;  %v1636_v40 = vadd.f32 %v1633_v62, %v1628_v53 }
 0x9cd   :  { %v1637_v27 = vmax.f32 %v1635_v63, 0.0  ;;  %v1638_v43 = vmax.f32 %v1636_v40, 0.0 }
 0x9cf   :  { %v1640_v0 = vmul.f32 %v1638_v43, %v2900_v31  ;;  %v1639_v56 = vmul.f32 %v1637_v27, %v2898_v28 }
 0x9d1   :  { %v1641_v55 = vpack.c.bf16 %v1640_v0, %v1639_v56 }
 0x9d3   :  { %2288 = vmatmul.mubr.bf16.vlgmr.msra.gmra.mrb[20].mxu1 %v1641_v55 }
 0xa23   :  { %v1837_v53 = vpop.xlane.xlu0 %1836 }
 0xa24   :  { %vm1842_vm3 = vcmp.eq.f32.partialorder %v1837_v53, inf  ;;  %v1845_v43 = vand.u32 2147483648, %v1837_v53  ;;  %vm1844_vm4 = vcmp.eq.f32.partialorder %v1837_v53, 0.0 }
 0xa25   :  { %v1839_v62 = vpop.xlane.xlu1 %1838 }
 0xa26   :  { %vm1849_vm5 = vcmp.eq.f32.partialorder %v1839_v62, inf  ;;  %v1852_v55 = vand.u32 2147483648, %v1839_v62  ;;  %vm1851_vm6 = vcmp.eq.f32.partialorder %v1839_v62, 0.0 }
 0xaa6   :  { %v1724_v5 = vpop.f32.mrb[20].mxu1 }
 0xaa7   :  { %v2289_v57 = vpop.f32.mrb[21].mxu1  ;;  %v1731_v54 = vmul.f32 %v1724_v5, %v2898_v28 }
 0xaa8   :  { %v1727_v46 = vpop.f32.mrb[22].mxu1 }
 0xaa9   :  { %v1732_v47 = vmul.f32 %v1727_v46, %v2900_v31  ;;  %v2290_v59 = vpop.f32.mrb[23].mxu1 }
 0xaab   :  { %v1733_v60 = vadd.f32 %v1732_v47, %v1731_v54 }
 0xaad   :  { %v1734_v48 = vrot.slane %v1733_v60, 4 }
 0xaaf   :  { %v1735_v58 = vadd.f32 %v1734_v48, %v1733_v60 }
 0xab1   :  { %v1736_v2 = vrot.slane %v1735_v58, 2 }
 0xab3   :  { %v1737_v3 = vadd.f32 %v1736_v2, %v1735_v58 }
 0xab5   :  { %v1738_v4 = vrot.slane %v1737_v3, 1 }
 0xab7   :  { %v1739_v6 = vadd.f32 %v1738_v4, %v1737_v3 }
 0xab9   :  { %v1740_v7 = vmul.f32 0.5, %v1739_v6 }
 0xabb   :  { %v1741_v8 = vsub.f32 %v1724_v5, %v1740_v7  ;;  %v1742_v10 = vsub.f32 %v1727_v46, %v1740_v7 }
 0xabd   :  { %v1743_v11 = vmul.f32 %v1741_v8, %v2898_v28  ;;  %v1744_v13 = vmul.f32 %v1742_v10, %v2900_v31 }
 0xabf   :  { %v1745_v14 = vmul.f32 %v1743_v11, %v1743_v11  ;;  %v1746_v15 = vmul.f32 %v1744_v13, %v1744_v13 }
 0xac1   :  { %v1747_v16 = vadd.f32 %v1746_v15, %v1745_v14 }
 0xac3   :  { %v1748_v17 = vrot.slane %v1747_v16, 4 }
 0xac5   :  { %v1749_v23 = vadd.f32 %v1748_v17, %v1747_v16 }
 0xac7   :  { %v1750_v24 = vrot.slane %v1749_v23, 2 }
 0xac9   :  { %v1751_v25 = vadd.f32 %v1750_v24, %v1749_v23 }
 0xacb   :  { %v1752_v26 = vrot.slane %v1751_v25, 1 }
 0xacd   :  { %v1753_v30 = vadd.f32 %v1752_v26, %v1751_v25 }
 0xacf   :  { %v1754_v41 = vmul.f32 0.5, %v1753_v30 }
 0xad1   :  { %v1755_v42 = vadd.f32 1e-05, %v1754_v41 }
 0xad3   :  { %2396 = vrsqrt.f32 %v1755_v42 }
 0xad4   :  { %2398 = vrsqrt.f32 %v1837_v53 }
 0xad5   :  { %2400 = vrsqrt.f32 %v1839_v62 }
 0xadd   :  { %v2397_v45 = vpop.eup %2396 }
 0xade   :  { %v1757_v20 = vmul.f32 %v2397_v45, %v1991_v9  ;;  %v2414_v9 = vld [vmem:[%s3062_s5] sm:$0xff] }
 0xae0   :  { %v1758_v21 = vmul.f32 %v1757_v20, %v1740_v7  ;;  %v1764_v22 = vrot.slane %v1757_v20, %v2773_v18 }
 0xae2   :  { %v1759_v61 = vsub.f32 %v1992_v19, %v1758_v21  ;;  %v1766_v38 = vmul.f32 %v1764_v22, %v1724_v5  ;;  %v1767_v36 = vmul.f32 %v1764_v22, %v1727_v46 }
 0xae4   :  { %v1772_v34 = vrot.slane %v1759_v61, %v2773_v18  ;;  %v2399_v18 = vpop.eup %2398 }
 0xae5   :  { %v1841_v40 = vmul.f32 %v2399_v18, %v1837_v53  ;;  %v2401_v27 = vpop.eup %2400 }
 0xae6   :  { %v1774_v33 = vadd.f32 %v1772_v34, %v1766_v38  ;;  %v1775_v35 = vadd.f32 %v1772_v34, %v1767_v36  ;;  %v1848_v0 = vmul.f32 %v2401_v27, %v1839_v62 }
 0xae8   :  { %v1777_v44 = vmax.f32 %v1775_v35, 0.0  ;;  %v1776_v37 = vmax.f32 %v1774_v33, 0.0  ;;  %v1850_v5 = vsel %vm1849_vm5, %v1839_v62, %v1848_v0 }
 0xae9   :  { %v1853_v47 = vsel %vm1851_vm6, %v1852_v55, %v1850_v5 }
 0xaea   :  { %v1778_v39 = vmul.f32 %v1776_v37, %v2898_v28  ;;  %v1779_v49 = vmul.f32 %v1777_v44, %v2900_v31  ;;  %v1843_v31 = vsel %vm1842_vm3, %v1837_v53, %v1841_v40  ;;  %v1855_v2 = vmax.f32 %v1853_v47, 1e-12 }
 0xaeb   :  { %v1846_v56 = vsel %vm1844_vm4, %v1845_v43, %v1843_v31 }
 0xaec   :  { %v1780_v50 = vpack.c.bf16 %v1779_v49, %v1778_v39  ;;  %v1854_v46 = vmax.f32 %v1846_v56, 1e-12 }
 0xaee   :  { %v1832_v51 = vunpack.c.l.bf16 %v1780_v50  ;;  %v1833_v29 = vunpack.c.h.bf16 %v1780_v50 }
 0xaf0   :  { %v1860_v52 = vmul.f32 %v1832_v51, %v1832_v51  ;;  %v1861_v32 = vmul.f32 %v1833_v29, %v1833_v29 }
 0xaf2   :  { %1862 = vadd.xlane.f32.xlu0 %v1860_v52 }
 0xaf6   :  { %1864 = vadd.xlane.f32.xlu0 %v1861_v32 }
 0xb7f   :  { %v1863_v63 = vpop.xlane.xlu0 %1862 }
 0xb80   :  { %2402 = vrsqrt.f32 %v1863_v63  ;;  %vm1868_vm7 = vcmp.eq.f32.partialorder %v1863_v63, inf  ;;  %v1871_v59 = vand.u32 2147483648, %v1863_v63  ;;  %vm1870_vm8 = vcmp.eq.f32.partialorder %v1863_v63, 0.0 }
 0xb83   :  { %v1865_v28 = vpop.xlane.xlu0 %1864 }
 0xb84   :  { %2404 = vrsqrt.f32 %v1865_v28  ;;  %vm1875_vm9 = vcmp.eq.f32.partialorder %v1865_v28, inf  ;;  %v1878_v6 = vand.u32 2147483648, %v1865_v28  ;;  %vm1877_vm10 = vcmp.eq.f32.partialorder %v1865_v28, 0.0 }
 0xb85   :  { %2406 = vrcp.f32 %v1854_v46 }
 0xb8a   :  { %v2403_v57 = vpop.eup %2402 }
 0xb8b   :  { %v1867_v54 = vmul.f32 %v2403_v57, %v1863_v63 }
 0xb8d   :  { %v1869_v60 = vsel %vm1868_vm7, %v1863_v63, %v1867_v54 }
 0xb8e   :  { %v2405_v48 = vpop.eup %2404  ;;  %v1872_v58 = vsel %vm1870_vm8, %v1871_v59, %v1869_v60 }
 0xb8f   :  { %v1880_v3 = vmax.f32 %v1872_v58, 1e-12  ;;  %v1874_v4 = vmul.f32 %v2405_v48, %v1865_v28  ;;  %v2407_v11 = vpop.eup %2406 }
 0xb90   :  { %v1857_v14 = vmul.f32 %v2407_v11, %v3003_v12  ;;  %v2415_v12 = vld [vmem:[%s3062_s5 + $0x8] sm:$0xff] }
 0xb91   :  { %v1876_v7 = vsel %vm1875_vm9, %v1865_v28, %v1874_v4  ;;  %2408 = vrcp.f32 %v1880_v3 }
 0xb92   :  { %v1879_v8 = vsel %vm1877_vm10, %v1878_v6, %v1876_v7  ;;  %2410 = vrcp.f32 %v1855_v2 }
 0xb93   :  { %v1881_v10 = vmax.f32 %v1879_v8, 1e-12 }
 0xb95   :  { %2412 = vrcp.f32 %v1881_v10 }
 0xb9b   :  { %v2409_v13 = vpop.eup %2408 }
 0xb9c   :  { %v1883_v15 = vmul.f32 %v2409_v13, %v1832_v51  ;;  %v2411_v16 = vpop.eup %2410 }
 0xb9d   :  { %v1859_v24 = vmul.f32 %v2411_v16, %v3007_v1 }
 0xb9e   :  { %v1886_v17 = vmul.f32 %v1883_v15, %v1857_v14 }
 0xb9f   :  { %v2413_v23 = vpop.eup %2412 }
 0xba0   :  { %1888 = vadd.xlane.f32.xlu1 %v1886_v17  ;;  %v1885_v25 = vmul.f32 %v2413_v23, %v1833_v29 }
 0xba2   :  { %v1887_v26 = vmul.f32 %v1885_v25, %v1859_v24 }
 0xba4   :  { %1890 = vadd.xlane.f32.xlu0 %v1887_v26 }
 0xc2d   :  { %v1889_v30 = vpop.xlane.xlu1 %1888 }
 0xc2e   :  { %v1892_v41 = vsub.f32 1.0, %v1889_v30 }
 0xc30   :  { %v1894_v45 = vmul.f32 %v2414_v9, %v1892_v41 }
 0xc31   :  { %v1891_v42 = vpop.xlane.xlu0 %1890 }
 0xc32   :  { %v1893_v20 = vsub.f32 1.0, %v1891_v42  ;;  %v1897_v21 = vsel %vm1896_vm11, %v1894_v45, 0.0 }
 0xc34   :  { %v1895_v19 = vmul.f32 %v2415_v12, %v1893_v20 }
 0xc36   :  { %v1898_v1 = vsel %vm1896_vm11, %v1895_v19, 0.0 }
 0xc37   :  { %v1899_v22 = vadd.f32 %v1898_v1, %v1897_v21 }
 0xc39   :  { %v1900_v61 = vrot.slane %v1899_v22, 4 }
 0xc3b   :  { %v1901_v38 = vadd.f32 %v1900_v61, %v1899_v22 }
 0xc3d   :  { %v1902_v36 = vrot.slane %v1901_v38, 2 }
 0xc3f   :  { %v1903_v34 = vadd.f32 %v1902_v36, %v1901_v38 }
 0xc41   :  { %v1904_v33 = vrot.slane %v1903_v34, 1 }
 0xc43   :  { %v1905_v35 = vadd.f32 %v1904_v33, %v1903_v34 }
 0xc45   :  { %v1906_v44 = vmul.f32 0.5, %v1905_v35 }
 0xc47   :  { %1908 = vst.msk [vmem:[#allocation10] sm:$0x1] %vm1907_vm12, %v1906_v44 }
 0xc48   :  { %2515 = shalt.err (!%p2512_p8)
}
 0xc49   :  { %s2516_s3 = scalar_lea.hbm %s3076_s19, 16 }
 0xc4a   :  { %p2517_p9 = scmp.ne.s32.totalorder %s3076_s19, %s2516_s3  ;;  %p2520_p10 = scmp.lt.u32.totalorder %s2516_s3, %s3076_s19 }
 0xc4c   :  { %p2522_p11 = pnand %p2520_p10, %p2517_p9 }
 0xc4e   :  { %2525 = shalt.err (!%p2522_p11)
}
 0xc4f   :  { %1918 = dma.vmem_to_hbm [thread:$0]  %s1916_s29, 16, %s3076_s19, [#allocation4]  }
 0xc50   :  { %2532 = dma.done.wait [#allocation4], 16  }
 0xc51   :  { %2533 = vsyncadd [#allocation4], 4294967280 }
 0xc52   :  { %1922 = vsyncpa [#allocation3], 1 }
 0xc53   :  { %1923 = vsyncpa [#allocation6], 1 }
 0xc54   :  { %1924 = vsyncpa [#allocation9], 1 }
 0xc55   :  { %1925 = vsyncpa [#allocation4], 1 }

</bundles_post_ra>
